<compile_context>
chip_gen: v6e
topology: v6e:2x2x1
jax: 0.10.0
libtpu: 0.0.40
codegen_flags: <defaults>
</compile_context>

<pallas_src>
import numpy as np
import jax
import jax.numpy as jnp
from jax.experimental import pallas as pl
from jax.experimental.pallas import tpu as pltpu


# ----------------------------- Pallas kernels ------------------------------ #

def encoder_kernel(x_ref, mask_ref,
                   wqkv_ref, bqkv_ref, wo_ref, bo_ref,
                   g1_ref, beta1_ref,
                   w1_ref, b1_ref, w2_ref, b2_ref,
                   g2_ref, beta2_ref,
                   o_ref):
    """Full encoder layer for one chunk: fused QKV + attention + FFN + LNs."""
    x = x_ref[0]                                        # (S, D) bf16
    S, D = x.shape

    # Fused QKV projection: single (S, D) x (D, 3D) MXU matmul, f32 accumulate.
    qkv = jnp.dot(x, wqkv_ref[...],
                  preferred_element_type=jnp.float32) + bqkv_ref[...]   # (S, 3D)
    scale = 1.0 / jnp.sqrt(jnp.float32(D))
    q = (qkv[:, :D] * scale).astype(jnp.bfloat16)       # fold 1/sqrt(d) into q
    k = qkv[:, D:2 * D].astype(jnp.bfloat16)
    v = qkv[:, 2 * D:].astype(jnp.bfloat16)

    # Key-padding bias built in-kernel from the int mask (couple of VPU ops).
    mask = mask_ref[0]                                  # (1, S) int32
    bias = jnp.where(mask > 0, 0.0, -1e9).astype(jnp.float32)

    # Scores: contract the D axis of q and k directly (no explicit transpose).
    s = jax.lax.dot_general(q, k, (((1,), (1,)), ((), ())),
                            preferred_element_type=jnp.float32)         # (S, S)
    s = s + bias
    s = s - jnp.max(s, axis=-1, keepdims=True)
    p = jnp.exp(s)
    inv = pl.reciprocal(jnp.sum(p, axis=-1, keepdims=True), approx=True)
    p = (p * inv).astype(jnp.bfloat16)

    attn = jnp.dot(p, v, preferred_element_type=jnp.float32)            # (S, D)
    o = jnp.dot(attn.astype(jnp.bfloat16), wo_ref[...],
                preferred_element_type=jnp.float32) + bo_ref[...]

    # residual + LayerNorm 1 (f32)
    h = x.astype(jnp.float32) + o
    mu = jnp.mean(h, axis=-1, keepdims=True)
    var = jnp.mean((h - mu) ** 2, axis=-1, keepdims=True)
    h = (h - mu) * jax.lax.rsqrt(var + 1e-5) * g1_ref[...] + beta1_ref[...]

    # FFN (bf16 matmuls, f32 accumulate)
    # TODO(synk): tanh-approx GELU; torch nn.GELU default is the exact erf form.
    ff = jnp.dot(h.astype(jnp.bfloat16), w1_ref[...],
                 preferred_element_type=jnp.float32) + b1_ref[...]
    ff = jax.nn.gelu(ff, approximate=True)
    ff = jnp.dot(ff.astype(jnp.bfloat16), w2_ref[...],
                 preferred_element_type=jnp.float32) + b2_ref[...]

    # residual + LayerNorm 2 (f32)
    y = h + ff
    mu2 = jnp.mean(y, axis=-1, keepdims=True)
    var2 = jnp.mean((y - mu2) ** 2, axis=-1, keepdims=True)
    y = (y - mu2) * jax.lax.rsqrt(var2 + 1e-5) * g2_ref[...] + beta2_ref[...]

    o_ref[0] = y.astype(o_ref.dtype)                    # bf16 writeback


def classifier_kernel(e_ref, w_ref, b_ref, o_ref):
    # TODO(synk): dropout treated as identity (inference); torch RNG not reproducible.
    o_ref[...] = (jnp.dot(e_ref[...], w_ref[...],
                          preferred_element_type=jnp.float32) + b_ref[...])


# ------------------------------ wrappers ----------------------------------- #

def encoder_forward(x, mask3, p):
    """x: (B,S,D) bf16; mask3: (B,1,S) int32 key mask (1 = attend, 0 = pad)."""
    B, S, D = x.shape
    F = p['w1'].shape[1]

    def wspec(shape):
        # constant-index weight spec; tiny weights -> default double buffering
        return pl.BlockSpec(shape, lambda b: (0, 0))

    return pl.pallas_call(
        encoder_kernel,
        out_shape=jax.ShapeDtypeStruct((B, S, D), jnp.bfloat16),
        grid=(B,),
        in_specs=[
            pl.BlockSpec((1, S, D), lambda b: (b, 0, 0)),   # x (full chunk)
            pl.BlockSpec((1, 1, S), lambda b: (b, 0, 0)),   # int key mask
            wspec((D, 3 * D)), wspec((1, 3 * D)),           # fused Wqkv, bqkv
            wspec((D, D)), wspec((1, D)),                   # Wo, bo
            wspec((1, D)), wspec((1, D)),                   # LN1 gamma, beta
            wspec((D, F)), wspec((1, F)),                   # FFN W1, b1
            wspec((F, D)), wspec((1, D)),                   # FFN W2, b2
            wspec((1, D)), wspec((1, D)),                   # LN2 gamma, beta
        ],
        out_specs=pl.BlockSpec((1, S, D), lambda b: (b, 0, 0)),
        compiler_params=pltpu.CompilerParams(
            dimension_semantics=("parallel",)),             # batch across TCs on v7x
    )(x, mask3,
      p['wqkv'], p['bqkv'], p['wo'], p['bo'],
      p['ln1_g'], p['ln1_b'],
      p['w1'], p['b1'], p['w2'], p['b2'],
      p['ln2_g'], p['ln2_b'])


def classifier(emb, w_pad, b_pad):
    """emb: (N_pad, D) bf16 with N_pad % 8 == 0; w_pad: (D, CP) bf16, CP % 128 == 0."""
    N = emb.shape[0]
    CP = w_pad.shape[1]
    return pl.pallas_call(
        classifier_kernel,
        out_shape=jax.ShapeDtypeStruct((N, CP), jnp.float32),
    )(emb, w_pad, b_pad)


# --------------------------- model forward (glue) --------------------------- #

def model_forward(params, input_ids_np, attention_mask_np, overlapping_counts,
                  sep_id):
    B, S = input_ids_np.shape
    input_ids = jnp.asarray(input_ids_np)
    attention_mask = jnp.asarray(attention_mask_np)

    # Mirror of the PyTorch global_attention_mask construction (<s> and </s>
    # tokens get global attention).  Subsumed by full attention in the kernel.
    gmask = jnp.zeros((B, S), dtype=jnp.int32).at[:, 0].set(1)
    gmask = jnp.where(input_ids == sep_id, 1, gmask)
    del gmask  # kept for forward-pass parity only

    # token + position embeddings (glue), cast to bf16 for MXU-friendly kernels
    x = (params['tok_emb'][input_ids]
         + params['pos_emb'][:S][None, :, :]).astype(jnp.bfloat16)
    mask3 = attention_mask.astype(jnp.int32).reshape(B, 1, S)

    # Dispatch the fused encoder (async); host index loop below overlaps it.
    hidden = encoder_forward(x, mask3, params)

    # Exact reproduction of the PyTorch selection loop:
    #   for each chunk i: idx_sep = nonzero(input_ids[i]==SEP);
    #   for j in range(left_i, len(idx_sep)-right_i): take hidden[i, j, :]
    # (note: j is the SEP *ordinal*, exactly as in the reference code).
    # Indices come from host-resident numpy input -> no device sync needed.
    rows, cols = [], []
    for i in range(B):
        idx_sep = np.nonzero(input_ids_np[i] == sep_id)[0]
        for j in range(overlapping_counts[i][0],
                       idx_sep.shape[0] - overlapping_counts[i][1]):
            rows.append(i)
            cols.append(j)
    n = len(rows)
    n_pad = max(8, ((n + 7) // 8) * 8)       # sublane-aligned static row count
    rows = rows + [0] * (n_pad - n)
    cols = cols + [0] * (n_pad - n)

    emb = hidden[jnp.asarray(rows, dtype=jnp.int32),
                 jnp.asarray(cols, dtype=jnp.int32), :]          # (n_pad, D) bf16

    logits_pad = classifier(emb, params['wc_pad'], params['bc_pad'])
    return logits_pad[:n, :params['n_classes']]


# ------------------------------ parameters ---------------------------------- #

def init_params(key, vocab, max_len, D, F, C):
    ks = jax.random.split(key, 10)

    def xavier(k, fin, fout, dtype=jnp.bfloat16):
        lim = float(np.sqrt(6.0 / (fin + fout)))
        w = jax.random.uniform(k, (fin, fout), jnp.float32, -lim, lim)
        return w.astype(dtype)

    p = {}
    p['tok_emb'] = jax.random.normal(ks[0], (vocab, D), jnp.float32) * 0.02
    p['pos_emb'] = jax.random.normal(ks[1], (max_len, D), jnp.float32) * 0.02
    # fused QKV weight (D, 3D) in bf16 (MXU operand); biases / LN params in f32
    wq = xavier(ks[2], D, D); wk = xavier(ks[3], D, D); wv = xavier(ks[4], D, D)
    p['wqkv'] = jnp.concatenate([wq, wk, wv], axis=1)            # (D, 3D) bf16
    p['bqkv'] = jnp.zeros((1, 3 * D), jnp.float32)
    p['wo'] = xavier(ks[5], D, D); p['bo'] = jnp.zeros((1, D), jnp.float32)
    p['ln1_g'] = jnp.ones((1, D), jnp.float32); p['ln1_b'] = jnp.zeros((1, D), jnp.float32)
    p['w1'] = xavier(ks[6], D, F); p['b1'] = jnp.zeros((1, F), jnp.float32)
    p['w2'] = xavier(ks[7], F, D); p['b2'] = jnp.zeros((1, D), jnp.float32)
    p['ln2_g'] = jnp.ones((1, D), jnp.float32); p['ln2_b'] = jnp.zeros((1, D), jnp.float32)
    # classifier head Linear(D, C), xavier_uniform_ weight; padded to a
    # lane-dense multiple of 128 output classes (sliced back in the wrapper)
    CP = ((C + 127) // 128) * 128
    wc = xavier(ks[8], D, C, dtype=jnp.float32)
    p['wc_pad'] = jnp.zeros((D, CP), jnp.float32).at[:, :C].set(wc).astype(jnp.bfloat16)
    p['bc_pad'] = jnp.zeros((1, CP), jnp.float32)
    p['n_classes'] = C
    return p


# --------------------------------- main -------------------------------------- #

if __name__ == "__main__":
    SEP_ID = 2
    # batch, seq, hidden, ffn, classes, vocab -- D/F multiples of 128, S of 8
    B, S, D, F, C, V = 2, 64, 128, 256, 4, 512

    key = jax.random.PRNGKey(0)
    ids = np.asarray(jax.random.randint(key, (B, S), 3, V, dtype=jnp.int32)).copy()
    ids[:, 0] = 1                               # <s>
    ids[0, [10, 20, 30]] = SEP_ID               # chunk 0: 3 </s> tokens
    ids[0, 40:] = 0                             # padding in chunk 0
    ids[1, [8, 16, 24, 32]] = SEP_ID            # chunk 1: 4 </s> tokens

    attn = np.ones((B, S), dtype=np.int32)
    attn[0, 40:] = 0

    # (left_overlap, right_overlap) per chunk -> 1 core sentence in chunk 0,
    # 3 core sentences in chunk 1 -> 4 logit rows total.
    overlapping_counts = [(1, 1), (0, 1)]

    params = init_params(jax.random.PRNGKey(0), V, S, D, F, C)
    logits = model_forward(params, ids, attn, overlapping_counts, SEP_ID)
    logits = jax.block_until_ready(logits)
    assert logits.shape == (4, C), logits.shape
    assert bool(jnp.all(jnp.isfinite(logits)))
    print("KERNEL_OK")
</pallas_src>

<mosaic_0001>
module attributes {stable_mosaic.version = 11 : i64} {
  func.func @encoder_kernel(%arg0: i32, %arg1: memref<1x64x128xbf16, #tpu.memory_space<vmem>>, %arg2: memref<1x1x64xi32, #tpu.memory_space<vmem>>, %arg3: memref<128x384xbf16, #tpu.memory_space<vmem>>, %arg4: memref<1x384xf32, #tpu.memory_space<vmem>>, %arg5: memref<128x128xbf16, #tpu.memory_space<vmem>>, %arg6: memref<1x128xf32, #tpu.memory_space<vmem>>, %arg7: memref<1x128xf32, #tpu.memory_space<vmem>>, %arg8: memref<1x128xf32, #tpu.memory_space<vmem>>, %arg9: memref<128x256xbf16, #tpu.memory_space<vmem>>, %arg10: memref<1x256xf32, #tpu.memory_space<vmem>>, %arg11: memref<256x128xbf16, #tpu.memory_space<vmem>>, %arg12: memref<1x128xf32, #tpu.memory_space<vmem>>, %arg13: memref<1x128xf32, #tpu.memory_space<vmem>>, %arg14: memref<1x128xf32, #tpu.memory_space<vmem>>, %arg15: memref<1x64x128xbf16, #tpu.memory_space<vmem>>) attributes {dimension_semantics = [#tpu.dimension_semantics<parallel>], iteration_bounds = array<i64: 2>, scalar_prefetch = 0 : i64, scratch_operands = 0 : i64, tpu.core_type = #tpu.core_type<tc>, window_params = [{transform_indices = @transform_0, window_bounds = array<i64: 1, 64, 128>}, {transform_indices = @transform_1, window_bounds = array<i64: 1, 1, 64>}, {pipeline_mode = #tpu.pipeline_mode<synchronous>, transform_indices = @transform_2, window_bounds = array<i64: 128, 384>}, {pipeline_mode = #tpu.pipeline_mode<synchronous>, transform_indices = @transform_3, window_bounds = array<i64: 1, 384>}, {pipeline_mode = #tpu.pipeline_mode<synchronous>, transform_indices = @transform_4, window_bounds = array<i64: 128, 128>}, {pipeline_mode = #tpu.pipeline_mode<synchronous>, transform_indices = @transform_5, window_bounds = array<i64: 1, 128>}, {pipeline_mode = #tpu.pipeline_mode<synchronous>, transform_indices = @transform_6, window_bounds = array<i64: 1, 128>}, {pipeline_mode = #tpu.pipeline_mode<synchronous>, transform_indices = @transform_7, window_bounds = array<i64: 1, 128>}, {pipeline_mode = #tpu.pipeline_mode<synchronous>, transform_indices = @transform_8, window_bounds = array<i64: 128, 256>}, {pipeline_mode = #tpu.pipeline_mode<synchronous>, transform_indices = @transform_9, window_bounds = array<i64: 1, 256>}, {pipeline_mode = #tpu.pipeline_mode<synchronous>, transform_indices = @transform_10, window_bounds = array<i64: 256, 128>}, {pipeline_mode = #tpu.pipeline_mode<synchronous>, transform_indices = @transform_11, window_bounds = array<i64: 1, 128>}, {pipeline_mode = #tpu.pipeline_mode<synchronous>, transform_indices = @transform_12, window_bounds = array<i64: 1, 128>}, {pipeline_mode = #tpu.pipeline_mode<synchronous>, transform_indices = @transform_13, window_bounds = array<i64: 1, 128>}, {transform_indices = @transform_14, window_bounds = array<i64: 1, 64, 128>}]} {
    %c0 = arith.constant 0 : index
    %c0_0 = arith.constant 0 : index
    %c0_1 = arith.constant 0 : index
    %0 = vector.load %arg1[%c0, %c0_0, %c0_1] : memref<1x64x128xbf16, #tpu.memory_space<vmem>>, vector<1x64x128xbf16>
    %1 = vector.shape_cast %0 : vector<1x64x128xbf16> to vector<64x128xbf16>
    %c0_2 = arith.constant 0 : index
    %c0_3 = arith.constant 0 : index
    %2 = vector.load %arg3[%c0_2, %c0_3] : memref<128x384xbf16, #tpu.memory_space<vmem>>, vector<128x384xbf16>
    %cst = arith.constant dense<0.000000e+00> : vector<64x384xf32>
    %3 = tpu.matmul %1, %2, %cst {dimension_numbers = #tpu.dot_dimension_numbers<[1], [0], [0], [1], [0, 0, 1, 1], [], []>} : vector<64x128xbf16>, vector<128x384xbf16>, vector<64x384xf32> -> vector<64x384xf32>
    %c0_4 = arith.constant 0 : index
    %c0_5 = arith.constant 0 : index
    %4 = vector.load %arg4[%c0_4, %c0_5] : memref<1x384xf32, #tpu.memory_space<vmem>>, vector<1x384xf32>
    %5 = vector.broadcast %4 : vector<1x384xf32> to vector<64x384xf32>
    %6 = arith.addf %3, %5 : vector<64x384xf32>
    %cst_6 = arith.constant 1.280000e+02 : f32
    %7 = math.sqrt %cst_6 : f32
    %cst_7 = arith.constant 1.000000e+00 : f32
    %8 = arith.divf %cst_7, %7 : f32
    %9 = vector.extract_strided_slice %6 {offsets = [0, 0], sizes = [64, 128], strides = [1, 1]} : vector<64x384xf32> to vector<64x128xf32>
    %10 = vector.broadcast %8 : f32 to vector<64x128xf32>
    %11 = arith.mulf %9, %10 : vector<64x128xf32>
    %12 = arith.truncf %11 : vector<64x128xf32> to vector<64x128xbf16>
    %13 = vector.extract_strided_slice %6 {offsets = [0, 128], sizes = [64, 128], strides = [1, 1]} : vector<64x384xf32> to vector<64x128xf32>
    %14 = arith.truncf %13 : vector<64x128xf32> to vector<64x128xbf16>
    %15 = vector.extract_strided_slice %6 {offsets = [0, 256], sizes = [64, 128], strides = [1, 1]} : vector<64x384xf32> to vector<64x128xf32>
    %16 = arith.truncf %15 : vector<64x128xf32> to vector<64x128xbf16>
    %c0_8 = arith.constant 0 : index
    %c0_9 = arith.constant 0 : index
    %c0_10 = arith.constant 0 : index
    %17 = vector.load %arg2[%c0_8, %c0_9, %c0_10] : memref<1x1x64xi32, #tpu.memory_space<vmem>>, vector<1x1x64xi32>
    %18 = vector.shape_cast %17 : vector<1x1x64xi32> to vector<1x64xi32>
    %c0_i32 = arith.constant 0 : i32
    %19 = vector.broadcast %c0_i32 : i32 to vector<1x64xi32>
    %20 = arith.cmpi sgt, %18, %19 : vector<1x64xi32>
    %cst_11 = arith.constant 0.000000e+00 : f32
    %cst_12 = arith.constant -1.000000e+09 : f32
    %21 = vector.broadcast %cst_11 : f32 to vector<1x64xf32>
    %22 = vector.broadcast %cst_12 : f32 to vector<1x64xf32>
    %23 = arith.select %20, %21, %22 : vector<1x64xi1>, vector<1x64xf32>
    %cst_13 = arith.constant dense<0.000000e+00> : vector<64x64xf32>
    %24 = tpu.matmul %12, %14, %cst_13 {dimension_numbers = #tpu.dot_dimension_numbers<[1], [1], [0], [0], [0, 0, 1, 0], [], []>} : vector<64x128xbf16>, vector<64x128xbf16>, vector<64x64xf32> -> vector<64x64xf32>
    %25 = vector.broadcast %23 : vector<1x64xf32> to vector<64x64xf32>
    %26 = arith.addf %24, %25 : vector<64x64xf32>
    %cst_14 = arith.constant dense<0xFF800000> : vector<64xf32>
    %27 = vector.multi_reduction <maximumf>, %26, %cst_14 [1] : vector<64x64xf32> to vector<64xf32>
    %28 = vector.shape_cast %27 : vector<64xf32> to vector<64x1xf32>
    %29 = vector.broadcast %28 : vector<64x1xf32> to vector<64x64xf32>
    %30 = arith.subf %26, %29 : vector<64x64xf32>
    %31 = math.exp %30 : vector<64x64xf32>
    %cst_15 = arith.constant dense<0.000000e+00> : vector<64xf32>
    %32 = vector.multi_reduction <add>, %31, %cst_15 [1] : vector<64x64xf32> to vector<64xf32>
    %33 = vector.shape_cast %32 : vector<64xf32> to vector<64x1xf32>
    %34 = tpu.reciprocal %33 {approx = true} : vector<64x1xf32> -> vector<64x1xf32>
    %35 = vector.broadcast %34 : vector<64x1xf32> to vector<64x64xf32>
    %36 = arith.mulf %31, %35 : vector<64x64xf32>
    %37 = arith.truncf %36 : vector<64x64xf32> to vector<64x64xbf16>
    %cst_16 = arith.constant dense<0.000000e+00> : vector<64x128xf32>
    %38 = tpu.matmul %37, %16, %cst_16 {dimension_numbers = #tpu.dot_dimension_numbers<[1], [0], [0], [1], [0, 0, 1, 1], [], []>} : vector<64x64xbf16>, vector<64x128xbf16>, vector<64x128xf32> -> vector<64x128xf32>
    %39 = arith.truncf %38 : vector<64x128xf32> to vector<64x128xbf16>
    %c0_17 = arith.constant 0 : index
    %c0_18 = arith.constant 0 : index
    %40 = vector.load %arg5[%c0_17, %c0_18] : memref<128x128xbf16, #tpu.memory_space<vmem>>, vector<128x128xbf16>
    %cst_19 = arith.constant dense<0.000000e+00> : vector<64x128xf32>
    %41 = tpu.matmul %39, %40, %cst_19 {dimension_numbers = #tpu.dot_dimension_numbers<[1], [0], [0], [1], [0, 0, 1, 1], [], []>} : vector<64x128xbf16>, vector<128x128xbf16>, vector<64x128xf32> -> vector<64x128xf32>
    %c0_20 = arith.constant 0 : index
    %c0_21 = arith.constant 0 : index
    %42 = vector.load %arg6[%c0_20, %c0_21] : memref<1x128xf32, #tpu.memory_space<vmem>>, vector<1x128xf32>
    %43 = vector.broadcast %42 : vector<1x128xf32> to vector<64x128xf32>
    %44 = arith.addf %41, %43 : vector<64x128xf32>
    %45 = arith.extf %1 : vector<64x128xbf16> to vector<64x128xf32>
    %46 = arith.addf %45, %44 : vector<64x128xf32>
    %cst_22 = arith.constant dense<0.000000e+00> : vector<64xf32>
    %47 = vector.multi_reduction <add>, %46, %cst_22 [1] : vector<64x128xf32> to vector<64xf32>
    %48 = vector.shape_cast %47 : vector<64xf32> to vector<64x1xf32>
    %cst_23 = arith.constant 1.280000e+02 : f32
    %49 = vector.broadcast %cst_23 : f32 to vector<64x1xf32>
    %50 = arith.divf %48, %49 : vector<64x1xf32>
    %51 = vector.broadcast %50 : vector<64x1xf32> to vector<64x128xf32>
    %52 = arith.subf %46, %51 : vector<64x128xf32>
    %53 = arith.mulf %52, %52 : vector<64x128xf32>
    %cst_24 = arith.constant dense<0.000000e+00> : vector<64xf32>
    %54 = vector.multi_reduction <add>, %53, %cst_24 [1] : vector<64x128xf32> to vector<64xf32>
    %55 = vector.shape_cast %54 : vector<64xf32> to vector<64x1xf32>
    %cst_25 = arith.constant 1.280000e+02 : f32
    %56 = vector.broadcast %cst_25 : f32 to vector<64x1xf32>
    %57 = arith.divf %55, %56 : vector<64x1xf32>
    %58 = vector.broadcast %50 : vector<64x1xf32> to vector<64x128xf32>
    %59 = arith.subf %46, %58 : vector<64x128xf32>
    %cst_26 = arith.constant 9.99999974E-6 : f32
    %60 = vector.broadcast %cst_26 : f32 to vector<64x1xf32>
    %61 = arith.addf %57, %60 : vector<64x1xf32>
    %62 = math.rsqrt %61 : vector<64x1xf32>
    %63 = vector.broadcast %62 : vector<64x1xf32> to vector<64x128xf32>
    %64 = arith.mulf %59, %63 : vector<64x128xf32>
    %c0_27 = arith.constant 0 : index
    %c0_28 = arith.constant 0 : index
    %65 = vector.load %arg7[%c0_27, %c0_28] : memref<1x128xf32, #tpu.memory_space<vmem>>, vector<1x128xf32>
    %66 = vector.broadcast %65 : vector<1x128xf32> to vector<64x128xf32>
    %67 = arith.mulf %64, %66 : vector<64x128xf32>
    %c0_29 = arith.constant 0 : index
    %c0_30 = arith.constant 0 : index
    %68 = vector.load %arg8[%c0_29, %c0_30] : memref<1x128xf32, #tpu.memory_space<vmem>>, vector<1x128xf32>
    %69 = vector.broadcast %68 : vector<1x128xf32> to vector<64x128xf32>
    %70 = arith.addf %67, %69 : vector<64x128xf32>
    %71 = arith.truncf %70 : vector<64x128xf32> to vector<64x128xbf16>
    %c0_31 = arith.constant 0 : index
    %c0_32 = arith.constant 0 : index
    %72 = vector.load %arg9[%c0_31, %c0_32] : memref<128x256xbf16, #tpu.memory_space<vmem>>, vector<128x256xbf16>
    %cst_33 = arith.constant dense<0.000000e+00> : vector<64x256xf32>
    %73 = tpu.matmul %71, %72, %cst_33 {dimension_numbers = #tpu.dot_dimension_numbers<[1], [0], [0], [1], [0, 0, 1, 1], [], []>} : vector<64x128xbf16>, vector<128x256xbf16>, vector<64x256xf32> -> vector<64x256xf32>
    %c0_34 = arith.constant 0 : index
    %c0_35 = arith.constant 0 : index
    %74 = vector.load %arg10[%c0_34, %c0_35] : memref<1x256xf32, #tpu.memory_space<vmem>>, vector<1x256xf32>
    %75 = vector.broadcast %74 : vector<1x256xf32> to vector<64x256xf32>
    %76 = arith.addf %73, %75 : vector<64x256xf32>
    %77 = arith.mulf %76, %76 : vector<64x256xf32>
    %78 = arith.mulf %76, %77 : vector<64x256xf32>
    %cst_36 = arith.constant 4.471500e-02 : f32
    %79 = vector.broadcast %cst_36 : f32 to vector<64x256xf32>
    %80 = arith.mulf %79, %78 : vector<64x256xf32>
    %81 = arith.addf %76, %80 : vector<64x256xf32>
    %cst_37 = arith.constant 0.797884583 : f32
    %82 = vector.broadcast %cst_37 : f32 to vector<64x256xf32>
    %83 = arith.mulf %82, %81 : vector<64x256xf32>
    %84 = math.tanh %83 : vector<64x256xf32>
    %cst_38 = arith.constant 1.000000e+00 : f32
    %85 = vector.broadcast %cst_38 : f32 to vector<64x256xf32>
    %86 = arith.addf %85, %84 : vector<64x256xf32>
    %cst_39 = arith.constant 5.000000e-01 : f32
    %87 = vector.broadcast %cst_39 : f32 to vector<64x256xf32>
    %88 = arith.mulf %87, %86 : vector<64x256xf32>
    %89 = arith.mulf %76, %88 : vector<64x256xf32>
    %90 = arith.truncf %89 : vector<64x256xf32> to vector<64x256xbf16>
    %c0_40 = arith.constant 0 : index
    %c0_41 = arith.constant 0 : index
    %91 = vector.load %arg11[%c0_40, %c0_41] : memref<256x128xbf16, #tpu.memory_space<vmem>>, vector<256x128xbf16>
    %cst_42 = arith.constant dense<0.000000e+00> : vector<64x128xf32>
    %92 = tpu.matmul %90, %91, %cst_42 {dimension_numbers = #tpu.dot_dimension_numbers<[1], [0], [0], [1], [0, 0, 1, 1], [], []>} : vector<64x256xbf16>, vector<256x128xbf16>, vector<64x128xf32> -> vector<64x128xf32>
    %c0_43 = arith.constant 0 : index
    %c0_44 = arith.constant 0 : index
    %93 = vector.load %arg12[%c0_43, %c0_44] : memref<1x128xf32, #tpu.memory_space<vmem>>, vector<1x128xf32>
    %94 = vector.broadcast %93 : vector<1x128xf32> to vector<64x128xf32>
    %95 = arith.addf %92, %94 : vector<64x128xf32>
    %96 = arith.addf %70, %95 : vector<64x128xf32>
    %cst_45 = arith.constant dense<0.000000e+00> : vector<64xf32>
    %97 = vector.multi_reduction <add>, %96, %cst_45 [1] : vector<64x128xf32> to vector<64xf32>
    %98 = vector.shape_cast %97 : vector<64xf32> to vector<64x1xf32>
    %cst_46 = arith.constant 1.280000e+02 : f32
    %99 = vector.broadcast %cst_46 : f32 to vector<64x1xf32>
    %100 = arith.divf %98, %99 : vector<64x1xf32>
    %101 = vector.broadcast %100 : vector<64x1xf32> to vector<64x128xf32>
    %102 = arith.subf %96, %101 : vector<64x128xf32>
    %103 = arith.mulf %102, %102 : vector<64x128xf32>
    %cst_47 = arith.constant dense<0.000000e+00> : vector<64xf32>
    %104 = vector.multi_reduction <add>, %103, %cst_47 [1] : vector<64x128xf32> to vector<64xf32>
    %105 = vector.shape_cast %104 : vector<64xf32> to vector<64x1xf32>
    %cst_48 = arith.constant 1.280000e+02 : f32
    %106 = vector.broadcast %cst_48 : f32 to vector<64x1xf32>
    %107 = arith.divf %105, %106 : vector<64x1xf32>
    %108 = vector.broadcast %100 : vector<64x1xf32> to vector<64x128xf32>
    %109 = arith.subf %96, %108 : vector<64x128xf32>
    %cst_49 = arith.constant 9.99999974E-6 : f32
    %110 = vector.broadcast %cst_49 : f32 to vector<64x1xf32>
    %111 = arith.addf %107, %110 : vector<64x1xf32>
    %112 = math.rsqrt %111 : vector<64x1xf32>
    %113 = vector.broadcast %112 : vector<64x1xf32> to vector<64x128xf32>
    %114 = arith.mulf %109, %113 : vector<64x128xf32>
    %c0_50 = arith.constant 0 : index
    %c0_51 = arith.constant 0 : index
    %115 = vector.load %arg13[%c0_50, %c0_51] : memref<1x128xf32, #tpu.memory_space<vmem>>, vector<1x128xf32>
    %116 = vector.broadcast %115 : vector<1x128xf32> to vector<64x128xf32>
    %117 = arith.mulf %114, %116 : vector<64x128xf32>
    %c0_52 = arith.constant 0 : index
    %c0_53 = arith.constant 0 : index
    %118 = vector.load %arg14[%c0_52, %c0_53] : memref<1x128xf32, #tpu.memory_space<vmem>>, vector<1x128xf32>
    %119 = vector.broadcast %118 : vector<1x128xf32> to vector<64x128xf32>
    %120 = arith.addf %117, %119 : vector<64x128xf32>
    %121 = arith.truncf %120 : vector<64x128xf32> to vector<64x128xbf16>
    %c0_54 = arith.constant 0 : index
    %c0_55 = arith.constant 0 : index
    %c0_56 = arith.constant 0 : index
    %122 = vector.load %arg15[%c0_54, %c0_55, %c0_56] : memref<1x64x128xbf16, #tpu.memory_space<vmem>>, vector<1x64x128xbf16>
    %123 = vector.shape_cast %122 : vector<1x64x128xbf16> to vector<64x128xbf16>
    %124 = vector.shape_cast %121 : vector<64x128xbf16> to vector<1x64x128xbf16>
    tpu.vector_store %arg15[%c0_54, %c0_55, %c0_56], %124 {strides = array<i32>} : memref<1x64x128xbf16, #tpu.memory_space<vmem>>, vector<1x64x128xbf16>,
    return
  }
  func.func @transform_0(%arg0: i32) -> (i32, i32, i32) {
    %c0_i32 = arith.constant 0 : i32
    %c0_i32_0 = arith.constant 0 : i32
    %c0_i32_1 = arith.constant 0 : i32
    return %arg0, %c0_i32, %c0_i32_0 : i32, i32, i32
  }
  func.func @transform_1(%arg0: i32) -> (i32, i32, i32) {
    %c0_i32 = arith.constant 0 : i32
    %c0_i32_0 = arith.constant 0 : i32
    %c0_i32_1 = arith.constant 0 : i32
    return %arg0, %c0_i32, %c0_i32_0 : i32, i32, i32
  }
  func.func @transform_2(%arg0: i32) -> (i32, i32) {
    %c0_i32 = arith.constant 0 : i32
    %c0_i32_0 = arith.constant 0 : i32
    %c0_i32_1 = arith.constant 0 : i32
    return %c0_i32, %c0_i32_0 : i32, i32
  }
  func.func @transform_3(%arg0: i32) -> (i32, i32) {
    %c0_i32 = arith.constant 0 : i32
    %c0_i32_0 = arith.constant 0 : i32
    %c0_i32_1 = arith.constant 0 : i32
    return %c0_i32, %c0_i32_0 : i32, i32
  }
  func.func @transform_4(%arg0: i32) -> (i32, i32) {
    %c0_i32 = arith.constant 0 : i32
    %c0_i32_0 = arith.constant 0 : i32
    %c0_i32_1 = arith.constant 0 : i32
    return %c0_i32, %c0_i32_0 : i32, i32
  }
  func.func @transform_5(%arg0: i32) -> (i32, i32) {
    %c0_i32 = arith.constant 0 : i32
    %c0_i32_0 = arith.constant 0 : i32
    %c0_i32_1 = arith.constant 0 : i32
    return %c0_i32, %c0_i32_0 : i32, i32
  }
  func.func @transform_6(%arg0: i32) -> (i32, i32) {
    %c0_i32 = arith.constant 0 : i32
    %c0_i32_0 = arith.constant 0 : i32
    %c0_i32_1 = arith.constant 0 : i32
    return %c0_i32, %c0_i32_0 : i32, i32
  }
  func.func @transform_7(%arg0: i32) -> (i32, i32) {
    %c0_i32 = arith.constant 0 : i32
    %c0_i32_0 = arith.constant 0 : i32
    %c0_i32_1 = arith.constant 0 : i32
    return %c0_i32, %c0_i32_0 : i32, i32
  }
  func.func @transform_8(%arg0: i32) -> (i32, i32) {
    %c0_i32 = arith.constant 0 : i32
    %c0_i32_0 = arith.constant 0 : i32
    %c0_i32_1 = arith.constant 0 : i32
    return %c0_i32, %c0_i32_0 : i32, i32
  }
  func.func @transform_9(%arg0: i32) -> (i32, i32) {
    %c0_i32 = arith.constant 0 : i32
    %c0_i32_0 = arith.constant 0 : i32
    %c0_i32_1 = arith.constant 0 : i32
    return %c0_i32, %c0_i32_0 : i32, i32
  }
  func.func @transform_10(%arg0: i32) -> (i32, i32) {
    %c0_i32 = arith.constant 0 : i32
    %c0_i32_0 = arith.constant 0 : i32
    %c0_i32_1 = arith.constant 0 : i32
    return %c0_i32, %c0_i32_0 : i32, i32
  }
  func.func @transform_11(%arg0: i32) -> (i32, i32) {
    %c0_i32 = arith.constant 0 : i32
    %c0_i32_0 = arith.constant 0 : i32
    %c0_i32_1 = arith.constant 0 : i32
    return %c0_i32, %c0_i32_0 : i32, i32
  }
  func.func @transform_12(%arg0: i32) -> (i32, i32) {
    %c0_i32 = arith.constant 0 : i32
    %c0_i32_0 = arith.constant 0 : i32
    %c0_i32_1 = arith.constant 0 : i32
    return %c0_i32, %c0_i32_0 : i32, i32
  }
  func.func @transform_13(%arg0: i32) -> (i32, i32) {
    %c0_i32 = arith.constant 0 : i32
    %c0_i32_0 = arith.constant 0 : i32
    %c0_i32_1 = arith.constant 0 : i32
    return %c0_i32, %c0_i32_0 : i32, i32
  }
  func.func @transform_14(%arg0: i32) -> (i32, i32, i32) {
    %c0_i32 = arith.constant 0 : i32
    %c0_i32_0 = arith.constant 0 : i32
    %c0_i32_1 = arith.constant 0 : i32
    return %arg0, %c0_i32, %c0_i32_0 : i32, i32, i32
  }
}

</mosaic_0001>

<bundles_post_ra>
// kernel: tpu_custom_call.1
= control target key start
LH: loop header
LB: loop body
LE: loop exit
PB: predicated region body
PF: predicated region fallthrough
CT: control target
= control target key end

     0   :  { %s3870_s0 = inlined_call_operand.hbm [shape: bf16[2,64,128], index: 0, kind: input, shape index: {}]   ;;  %s3871_s1 = inlined_call_operand.hbm [shape: s32[2,1,64], index: 1, kind: input, shape index: {}]   ;;  %s3872_s2 = inlined_call_operand.hbm [shape: bf16[128,384], index: 2, kind: input, shape index: {}]   ;;  %s3873_s3 = inlined_call_operand.vmem [shape: f32[1,384], index: 3, kind: input, shape index: {}]   ;;  %s3874_s4 = inlined_call_operand.hbm [shape: bf16[128,128], index: 4, kind: input, shape index: {}]   ;;  %s3875_s5 = inlined_call_operand.vmem [shape: f32[1,128], index: 5, kind: input, shape index: {}]   ;;  %s3876_s6 = inlined_call_operand.vmem [shape: f32[1,128], index: 6, kind: input, shape index: {}]   ;;  %s3877_s7 = inlined_call_operand.vmem [shape: f32[1,128], index: 7, kind: input, shape index: {}]   ;;  %s3878_s8 = inlined_call_operand.hbm [shape: bf16[128,256], index: 8, kind: input, shape index: {}]   ;;  %s3879_s9 = inlined_call_operand.vmem [shape: f32[1,256], index: 9, kind: input, shape index: {}]   ;;  %s3880_s10 = inlined_call_operand.hbm [shape: bf16[256,128], index: 10, kind: input, shape index: {}]   ;;  %s3881_s11 = inlined_call_operand.vmem [shape: f32[1,128], index: 11, kind: input, shape index: {}]   ;;  %s3882_s12 = inlined_call_operand.vmem [shape: f32[1,128], index: 12, kind: input, shape index: {}]   ;;  %s3883_s13 = inlined_call_operand.vmem [shape: f32[1,128], index: 13, kind: input, shape index: {}]   ;;  %s3884_s14 = inlined_call_operand.hbm [shape: bf16[2,64,128], index: 14, kind: output, shape index: {}]  }
   0x1   :  { %3900 = sst [smem:[#allocation26_spill]] %s3870_s0 }
   0x2   :  { %3901 = sst [smem:[#allocation27_spill]] %s3872_s2 }
   0x3   :  { %3902 = sst [smem:[#allocation28_spill]] %s3874_s4 }
   0x4   :  { %3903 = sst [smem:[#allocation29_spill]] %s3878_s8 }
   0x5   :  { %3904 = sst [smem:[#allocation30_spill]] %s3880_s10 }
   0x6   :  { %3905 = sst [smem:[#allocation31_spill]] %s3883_s13 }
   0x7   :  { %3906 = sst [smem:[#allocation32_spill]] %s3884_s14 }
   0x8   :  { %19 = vsyncpa [#allocation3], 0 }
   0x9   :  { %21 = vsyncpa [#allocation3 + $0x1], 0 }
   0xa   :  { %22 = vsyncpa [#allocation6], 0 }
   0xb   :  { %24 = vsyncpa [#allocation6 + $0x1], 0 }
   0xc   :  { %25 = vsyncpa [#allocation9], 0 }
   0xd   :  { %26 = vsyncpa [#allocation12], 0 }
   0xe   :  { %27 = vsyncpa [#allocation4], 0 }
   0xf   :  { %29 = vsyncpa [#allocation4 + $0x1], 0  ;;  %s3251_s29 = smov 0   ;;  %s3253_s30 = smov 0  }
  0x10   :  { %s3255_s15 = smov 0   ;;  %s3257_s16 = smov 0  }
  0x11 LB: > { %3907 = sst [smem:[#allocation20_spill]] %s3145_s29  ;;  %s3272_s17 = sadd.s32 4294967295, %s3157_s16   ;;  %s3157_s16 = sphi %s3257_s16, %s3946_s16   ;;  %s3153_s15 = sphi %s3255_s15, %s3948_s15   ;;  %s3149_s30 = sphi %s3253_s30, %s3950_s30   ;;  %s3145_s29 = sphi %s3251_s29, %s3949_s29  }
  0x12   : > { %3908 = sst [smem:[#allocation21_spill]] %s3153_s15  ;;  %s2313_s18 = sadd.s32 4294967294, %s3157_s16  }
  0x13   : > { %p55_p0 = scmp.ne.s32.totalorder %s3149_s30, %s3145_s29  ;;  %p3886_p1 = scmp.eq.s32.totalorder %s3272_s17, 0 }
  0x14   : > { %p363_p3 = scmp.eq.s32.totalorder %s2313_s18, 1  ;;  %p2314_p5 = scmp.ge.s32.totalorder %s3157_s16, 1 }
  0x15   : > { %p3281_p4 = por %p3886_p1, %p55_p0  ;;  %p370_p7 = scmp.lt.s32.totalorder %s3157_s16, 3 }
  0x16   : > { %p3286_p6 = por %p363_p3, %p55_p0  ;;  %s3159_s22 = smov [#allocation7]  }
  0x17   : > { %s3909_s19 = scalar_select %p3281_p4, 1, 0 }
  0x18   : > { %s3910_s20 = scalar_select %p3286_p6, 1, 0 }
  0x19   : > { %p3291_p8 = pnand %p2314_p5, %p370_p7  ;;  %s382_s23 = sshll.u32 %s3159_s22, 4  ;;  %s383_s23 = int_to_ptr.vmem [resolvable:$true] %s382_s23 }
  0x1a   : > { %3911 = sst [smem:[#allocation22_spill]] %s3910_s20  ;;  %s3160_s25 = smov [#allocation8]  }
  0x1b   : > { %s3912_s21 = scalar_select %p3291_p8, 1, 0 }
  0x1c   : > { %p2653_p9 = pneg %p3291_p8  ;;  %s398_s26 = sshll.u32 %s3160_s25, 4  ;;  %s399_s26 = int_to_ptr.vmem [resolvable:$true] %s398_s26 }
  0x1d   : > { %s2928_s27 = scalar_lea.vmem %s383_s23, 3072  ;;  %p2936_p5 = scmp.lt.s32.totalorder %s383_s23, %s383_s23 }
  0x1e   : > { %p3300_p11 = pnand %p2653_p9, %p3886_p1  ;;  %p2929_p13 = scmp.ne.s32.totalorder %s383_s23, %s2928_s27 }
  0x1f   : > { %p2937_p7 = scmp.lt.s32.totalorder %s2928_s27, %s2928_s27 }
  0x20   : > { %p2919_p12 = pneg %p3300_p11 }
  0x21   : > { %p2938_p10 = por %p2937_p7, %p2936_p5 }
  0x22   : > { %p2931_p0 = pnand %p2929_p13, %p2919_p12 }
  0x24   : > { %p2932_p3 = pneg %p2931_p0 }
  0x26   : > { %p2939_p9 = pnand %p2938_p10, %p2932_p3 }
  0x28   : > { %2942 = shalt.err (!%p2939_p9)
}
  0x29   : > { %s3161_s28 = smov 192   ;;  %s3162_s18 = smov 12  }
  0x2a   : > { %s3914_s2 = sld [smem:[#allocation27_spill]]  ;;  %s2954_s20 = scalar_lea.vmem %s399_s26, 1024 }
  0x2b   : > { %p2955_p1 = scmp.ne.s32.totalorder %s399_s26, %s2954_s20  ;;  %p2962_p2 = scmp.lt.s32.totalorder %s399_s26, %s399_s26 }
  0x2c   : > { %p2963_p6 = scmp.lt.s32.totalorder %s2954_s20, %s2954_s20 }
  0x2d   : > { %p2957_p13 = pnand %p2955_p1, %p2919_p12 }
  0x2e   : > { %p2964_p5 = por %p2963_p6, %p2962_p2 }
  0x2f   : > { %p2958_p0 = pneg %p2957_p13 }
  0x30   : > { %2656 = dma.hbm_to_vmem [thread:$0]  (!%p3300_p11), %s3914_s2, 3072, %s383_s23, [#allocation6], %s3161_s28, %s3161_s28, %s3162_s18  }
  0x31   : > { %p2965_p10 = pnand %p2964_p5, %p2958_p0 }
  0x33   : > { %2968 = shalt.err (!%p2965_p10)
}
  0x34   : > { %s3888_s27 = smov 64   ;;  %s3890_s29 = smov 4  }
  0x35   : > { %s3915_s4 = sld [smem:[#allocation28_spill]]  ;;  %s3165_s18 = smov [#allocation10]  }
  0x36   : > { %s420_s22 = sshll.u32 %s3165_s18, 4  ;;  %s421_s22 = int_to_ptr.vmem [resolvable:$true] %s420_s22 }
  0x37   : > { %s2980_s25 = scalar_lea.vmem %s421_s22, 2048  ;;  %p2988_p3 = scmp.lt.s32.totalorder %s421_s22, %s421_s22 }
  0x38   : > { %p2981_p1 = scmp.ne.s32.totalorder %s421_s22, %s2980_s25  ;;  %p2989_p7 = scmp.lt.s32.totalorder %s2980_s25, %s2980_s25 }
  0x3a   : > { %p2983_p2 = pnand %p2981_p1, %p2919_p12  ;;  %p2990_p9 = por %p2989_p7, %p2988_p3 }
  0x3b   : > { %2659 = dma.hbm_to_vmem [thread:$0]  (!%p3300_p11), %s3915_s4, 1024, %s399_s26, [#allocation9], %s3888_s27, %s3888_s27, %s3890_s29  }
  0x3c   : > { %p2984_p6 = pneg %p2983_p2 }
  0x3e   : > { %p2991_p13 = pnand %p2990_p9, %p2984_p6 }
  0x40   : > { %2994 = shalt.err (!%p2991_p13)
}
  0x41   : > { %s3166_s20 = smov 128   ;;  %s3167_s2 = smov 8  }
  0x42   : > { %s3916_s8 = sld [smem:[#allocation29_spill]]  ;;  %s3168_s28 = smov [#allocation11]  }
  0x43   : > { %s436_s18 = sshll.u32 %s3168_s28, 4  ;;  %s437_s18 = int_to_ptr.vmem [resolvable:$true] %s436_s18 }
  0x44   : > { %s3006_s27 = scalar_lea.vmem %s437_s18, 2048  ;;  %p3014_p1 = scmp.lt.s32.totalorder %s437_s18, %s437_s18 }
  0x45   : > { %p3007_p0 = scmp.ne.s32.totalorder %s437_s18, %s3006_s27  ;;  %p3015_p2 = scmp.lt.s32.totalorder %s3006_s27, %s3006_s27 }
  0x47   : > { %p3009_p5 = pnand %p3007_p0, %p2919_p12  ;;  %p3016_p6 = por %p3015_p2, %p3014_p1 }
  0x48   : > { %2662 = dma.hbm_to_vmem [thread:$0]  (!%p3300_p11), %s3916_s8, 2048, %s421_s22, [#allocation9], %s3166_s20, %s3166_s20, %s3167_s2  }
  0x49   : > { %p3010_p10 = pneg %p3009_p5 }
  0x4b   : > { %p3017_p3 = pnand %p3016_p6, %p3010_p10 }
  0x4d   : > { %3020 = shalt.err (!%p3017_p3)
}
  0x4e   : > { %s3917_s25 = smov 64   ;;  %s3918_s10 = sld [smem:[#allocation30_spill]] }
  0x4f   : > { %s3345_s27 = sadd.s32 1, %s3157_s16   ;;  %s42_s24 = sadd.s32 1, %s3153_s15 }
  0x50   : > { %3919 = sst [smem:[#allocation23_spill]] %s3345_s27  ;;  %s39_s20 = ssub.s32 %s3157_s16, %s3345_s27 }
  0x51   : > { %p49_p12 = scmp.ne.s32.totalorder %s3153_s15, %s3149_s30  ;;  %p40_p7 = scmp.eq.s32.totalorder %s39_s20, 0 }
  0x52   : > { %p50_p9 = scmp.eq.s32.totalorder %s3157_s16, 0  ;;  %p3920_p13 = scmp.eq.s32.totalorder %s3272_s17, 1 }
  0x53   : > { %p2681_p5 = scmp.lt.s32.totalorder %s3157_s16, 2  ;;  %s3364_s28 = sand.u32 1, %s3153_s15  }
  0x54   : > { %2665 = dma.hbm_to_vmem [thread:$0]  (!%p3300_p11), %s3918_s10, 2048, %s437_s18, [#allocation12], %s3917_s25, %s3917_s25, %s3890_s29  }
  0x55   : > { %p3355_p0 = por %p3920_p13, %p49_p12  ;;  %p51_p10 = por %p50_p9, %p49_p12 }
  0x56   : > { %s3361_s23 = scalar_select %p40_p7, %s3153_s15, %s42_s24  }
  0x57   : > { %s3921_s26 = scalar_select %p3355_p0, 1, 0 }
  0x58   : > { %3923 = sst [smem:[#allocation25_spill]] %s3361_s23  ;;  %s2320_s18 = sshll.u32 %s3364_s28, 5 }
  0x59   : > { %3922 = sst [smem:[#allocation24_spill]] %s3921_s26  ;;  %s2422_s2 = sshll.u32 %s3157_s16, 9 }
  0x5a   : > { %s3924_s0 = sld [smem:[#allocation26_spill]]  ;;  %s463_s4 = scalar_lea.vmem [#allocation2], %s2320_s18 }
  0x5b   : > { %s470_s8 = sshll.u32 %s463_s4, 4  ;;  %p3375_p11 = pnand %p2681_p5, %p51_p10  ;;  %s3373_s8 = int_to_ptr.vmem [resolvable:$true] %s470_s8 }
  0x5d   : > { %p3023_p2 = pneg %p3375_p11 }
  0x60   : > { %s3371_s20 = scalar_lea.hbm %s3924_s0, %s2422_s2  ;;  %s3026_s18 = scalar_lea.hbm %s3924_s0, 1024 }
  0x61   : > { %s3021_s15 = scalar_lea.hbm %s3371_s20, 512  ;;  %p3027_p12 = scmp.lt.s32.totalorder %s3371_s20, %s3924_s0 }
  0x62   : > { %p3022_p1 = scmp.ne.s32.totalorder %s3371_s20, %s3021_s15  ;;  %p3028_p7 = scmp.lt.s32.totalorder %s3026_s18, %s3021_s15 }
  0x64   : > { %p3024_p6 = pnand %p3023_p2, %p3022_p1  ;;  %p3029_p9 = por %p3028_p7, %p3027_p12 }
  0x66   : > { %p3025_p3 = pneg %p3024_p6 }
  0x68   : > { %p3030_p13 = pnand %p3029_p9, %p3025_p3 }
  0x6a   : > { %3033 = shalt.err (!%p3030_p13)
}
  0x6b   : > { %s3034_s10 = scalar_lea.vmem %s3373_s8, 512  ;;  %s3169_s29 = smov [#allocation2]  }
  0x6c   : > { %p3035_p5 = scmp.ne.s32.totalorder %s3373_s8, %s3034_s10  ;;  %s3039_s4 = sshll.u32 %s3169_s29, 4  ;;  %s3040_s4 = int_to_ptr.vmem [resolvable:$false] %s3039_s4 }
  0x6d   : > { %s3041_s23 = scalar_lea.vmem %s3040_s4, 1024  ;;  %p3042_p6 = scmp.lt.s32.totalorder %s3373_s8, %s3040_s4 }
  0x6e   : > { %p3037_p10 = pnand %p3035_p5, %p3023_p2  ;;  %p3043_p0 = scmp.lt.s32.totalorder %s3041_s23, %s3034_s10 }
  0x70   : > { %p3038_p1 = pneg %p3037_p10  ;;  %p3044_p4 = por %p3043_p0, %p3042_p6 }
  0x72   : > { %p3045_p12 = pnand %p3044_p4, %p3038_p1 }
  0x74   : > { %3048 = shalt.err (!%p3045_p12)
}
  0x75   : > { %s3926_s15 = smov 4   ;;  %s3927_s18 = scalar_lea.sflag [#allocation3], %s3364_s28 }
  0x76   : > { %2669 = dma.hbm_to_vmem [thread:$0]  (!%p3375_p11), %s3371_s20, 512, %s3373_s8, %s3927_s18, %s3917_s25, %s3917_s25, %s3926_s15  }
  0x77   : > { %s2323_s2 = sshll.u32 %s3157_s16, 4  ;;  %s483_s22 = scalar_lea.vmem [#allocation5], %s3364_s28 }
  0x78   : > { %s490_s10 = sshll.u32 %s483_s22, 4  ;;  %s488_s4 = scalar_lea.hbm %s3871_s1, %s2323_s2  ;;  %s491_s10 = int_to_ptr.vmem [resolvable:$true] %s490_s10 }
  0x79   : > { %s3928_s0 = sand.u32 1, %s3157_s16   ;;  %s3049_s14 = scalar_lea.hbm %s488_s4, 16 }
  0x7a   : > { %s481_s27 = scalar_lea.sflag [#allocation6], %s3928_s0  ;;  %p3050_p4 = scmp.ne.s32.totalorder %s488_s4, %s3049_s14 }
  0x7b   : > { %s3054_s8 = scalar_lea.hbm %s3871_s1, 32  ;;  %p3055_p7 = scmp.lt.s32.totalorder %s488_s4, %s3871_s1 }
  0x7c   : > { %p3052_p0 = pnand %p3050_p4, %p3023_p2  ;;  %p3056_p9 = scmp.lt.s32.totalorder %s3054_s8, %s3049_s14 }
  0x7e   : > { %p3053_p3 = pneg %p3052_p0  ;;  %p3057_p13 = por %p3056_p9, %p3055_p7 }
  0x80   : > { %p3058_p5 = pnand %p3057_p13, %p3053_p3 }
  0x82   : > { %3061 = shalt.err (!%p3058_p5)
}
  0x83   : > { %s3062_s20 = scalar_lea.vmem %s491_s10, 16  ;;  %s3170_s0 = smov [#allocation5]  }
  0x84   : > { %p3063_p10 = scmp.ne.s32.totalorder %s491_s10, %s3062_s20  ;;  %s3067_s15 = sshll.u32 %s3170_s0, 4  ;;  %s3068_s15 = int_to_ptr.vmem [resolvable:$false] %s3067_s15 }
  0x85   : > { %s3069_s13 = scalar_lea.vmem %s3068_s15, 32  ;;  %p3070_p12 = scmp.lt.s32.totalorder %s491_s10, %s3068_s15 }
  0x86   : > { %p3065_p1 = pnand %p3063_p10, %p3023_p2  ;;  %p3071_p4 = scmp.lt.s32.totalorder %s3069_s13, %s3062_s20 }
  0x88   : > { %p3066_p6 = pneg %p3065_p1  ;;  %p3072_p0 = por %p3071_p4, %p3070_p12 }
  0x8a   : > { %p3073_p8 = pnand %p3072_p0, %p3066_p6 }
  0x8c   : > { %3076 = shalt.err (!%p3073_p8)
}
  0x8d   : > { %2672 = dma.hbm_to_vmem [thread:$0]  (!%p3375_p11), %s488_s4, 16, %s491_s10, %s481_s27  }
  0x8e   : > { %p3929_p3 = scmp.ne.s32.totalorder %s3912_s21, 0 }
  0x8f   : > { %s3434_s14 = sand.u32 (!%p3929_p3), 1, %s3149_s30   ;;  %p3930_p2 = scmp.ne.s32.totalorder (!%p3929_p3), %s3909_s19, 0 }
  0x90   : > { %499 = sbr.rel (%p3929_p3) target bundleno = 2472 (0x9a8), region = 76  ;;  %s2325_s26 = sshll.u32 (!%p3929_p3), %s3434_s14, 5 }
  0x91   : > { %s502_s18 = scalar_lea.sflag (!%p3929_p3), [#allocation3], %s3434_s14  ;;  %s3440_s2 = scalar_lea.vmem (!%p3929_p3), [#allocation2], %s2325_s26 }
  0x95   : > { %3120 = dma.done.wait (%p3930_p2), %s502_s18, 512  }
  0x96   : > { %3122 = vsyncadd (%p3930_p2), %s502_s18, 4294966784  ;;  %s510_s21 = sand.u32 1, %s3272_s17   ;;  %s513_s24 = scalar_lea.vmem [#allocation5], %s3434_s14 }
  0x97   : > { %s511_s27 = scalar_lea.sflag [#allocation6], %s510_s21 }
  0x98   : > { %3124 = dma.done.wait (%p3930_p2), %s511_s27, 16  }
  0x99   : > { %3126 = vsyncadd (%p3930_p2), %s511_s27, 4294967280  ;;  %p3931_p8 = scmp.eq.s32.totalorder %s3272_s17, 0 }
  0x9b   : > { %3128 = dma.done.wait (%p3931_p8), [#allocation6], 3072   ;;  %p3932_p11 = pmov %p3931_p8 }
  0x9c   : > { %p3933_p7 = pmov %p3931_p8 }
  0x9d   : > { %3130 = vsyncadd (%p3932_p11), [#allocation6], 4294964224 }
  0x9e   : > { %3132 = dma.done.wait (%p3933_p7), [#allocation9], 3072   ;;  %p3934_p9 = pmov %p3933_p7 }
  0x9f   : > { %p3935_p13 = pmov %p3933_p7 }
  0xa0   : > { %3134 = vsyncadd (%p3934_p9), [#allocation9], 4294964224 }
  0xa1   : > { %3136 = dma.done.wait (%p3935_p13), [#allocation12], 2048   ;;  %p3936_p5 = pmov %p3933_p7 }
  0xa2   : > { %v3171_v0 = vmov 0   ;;  %v2733_v1 = vld [vmem:[#allocation7 + $0xac] ss:$12 sps:$4 sm:$0xff]   ;;  %v2735_v2 = vld [vmem:[#allocation7 + $0xa8] ss:$12 sps:$4 sm:$0xff]   ;;  %v3466_v8 = vld [vmem:[%s3440_s2] sm:$0xff]   ;;  %v621_v21 = vlaneseq }
  0xa3   : > { %3138 = vsyncadd (%p3936_p5), [#allocation12], 4294965248  ;;  %820 = vmatprep.mubr.bf16.mxu0 %v3171_v0  ;;  %788 = vmatprep.subr.bf16.mxu0 %v2733_v1  ;;  %v2736_v3 = vld [vmem:[#allocation7 + $0x94] ss:$12 sps:$4 sm:$0xff]   ;;  %v2738_v4 = vld [vmem:[#allocation7 + $0x90] ss:$12 sps:$4 sm:$0xff]  }
  0xa4   : > { %789 = vmatpush1.bf16.msra.mxu0 %v2735_v2  ;;  %v2739_v5 = vld [vmem:[#allocation7 + $0x7c] ss:$12 sps:$4 sm:$0xff]   ;;  %v2741_v6 = vld [vmem:[#allocation7 + $0x78] ss:$12 sps:$4 sm:$0xff]   ;;  %v2744_v9 = vld [vmem:[#allocation7 + $0x60] ss:$12 sps:$4 sm:$0xff]   ;;  %2551 = vmatprep.mubr.bf16.mxu1 %v3466_v8 }
  0xa5   : > { %790 = vmatprep.subr.bf16.mxu0 %v2736_v3  ;;  %v2742_v7 = vld [vmem:[#allocation7 + $0x64] ss:$12 sps:$4 sm:$0xff]   ;;  %v2745_v10 = vld [vmem:[#allocation7 + $0x4c] ss:$12 sps:$4 sm:$0xff]   ;;  %v2747_v11 = vld [vmem:[#allocation7 + $0x48] ss:$12 sps:$4 sm:$0xff]  }
  0xa6   : > { %v2748_v12 = vld [vmem:[#allocation7 + $0x34] ss:$12 sps:$4 sm:$0xff]   ;;  %v2750_v13 = vld [vmem:[#allocation7 + $0x30] ss:$12 sps:$4 sm:$0xff]   ;;  %v2753_v15 = vld [vmem:[#allocation7 + $0x18] ss:$12 sps:$4 sm:$0xff]  }
  0xa7   : > { %v2751_v14 = vld [vmem:[#allocation7 + $0x1c] ss:$12 sps:$4 sm:$0xff]   ;;  %v2754_v16 = vld [vmem:[#allocation7 + $0x4] ss:$12 sps:$4 sm:$0xff]   ;;  %v2756_v17 = vld [vmem:[#allocation7] ss:$12 sps:$4 sm:$0xff]  }
  0xa8   : > { %791 = vmatpush1.bf16.msra.mxu0 %v2738_v4  ;;  %v3470_v18 = vld [vmem:[%s3440_s2 + $0x8] sm:$0xff]   ;;  %v3477_v19 = vld [vmem:[%s3440_s2 + $0x10] sm:$0xff]   ;;  %v3482_v20 = vld [vmem:[%s3440_s2 + $0x18] sm:$0xff]   ;;  %v3485_v22 = vshrl.u32 %v621_v21, 7  ;;  %vm1020_vm1 = vcmask 523264   ;;  %s3937_s27 = sld [smem:[#allocation31_spill]] }
  0xa9   : > { %792 = vmatprep.subr.bf16.mxu0 %v2739_v5  ;;  %v3493_v24 = vld [vmem:[%s3873_s3] sm:$0x7]  ;;  %s2431_s19 = sshll.u32 %s3272_s17, 9  ;;  %s3939_s29 = sld [smem:[#allocation32_spill]] }
  0xaa   : > { %v3488_v23 = vsub.s32 0, %v3485_v22  ;;  %v627_v44 = vsub.s32 1, %v3485_v22  ;;  %v2765_v21 = vld [vmem:[#allocation7 + $0x50] ss:$12 sps:$4 sm:$0xff]   ;;  %s2169_s25 = scalar_lea.sflag [#allocation4], %s3434_s14  ;;  %s3173_s17 = smov [#allocation13]  }
  0xab   : > { %s3081_s20 = sshll.u32 %s3173_s17, 4  ;;  %s3082_s20 = int_to_ptr.vmem [resolvable:$false] %s3081_s20 }
  0xac   : > { %793 = vmatpush1.bf16.msra.mxu0 %v2741_v6  ;;  %v624_v25 = vrot.slane %v3493_v24, %v3488_v23  ;;  %v628_v47 = vrot.slane %v3493_v24, %v627_v44  ;;  %s3083_s0 = scalar_lea.vmem %s3082_s20, 1024 }
  0xad   : > { %794 = vmatprep.subr.bf16.mxu0 %v2742_v7 }
  0xaf   : > { %s3940_s4 = smov %s3939_s29  ;;  %s3825_s8 = scalar_lea.hbm %s3939_s29, %s2431_s19 }
  0xb0   : > { %795 = vmatpush1.bf16.msra.mxu0 %v2744_v9 }
  0xb1   : > { %796 = vmatprep.subr.bf16.mxu0 %v2745_v10 }
  0xb4   : > { %797 = vmatpush1.bf16.msra.mxu0 %v2747_v11 }
  0xb5   : > { %798 = vmatprep.subr.bf16.mxu0 %v2748_v12 }
  0xb8   : > { %799 = vmatpush1.bf16.msra.mxu0 %v2750_v13 }
  0xb9   : > { %800 = vmatprep.subr.bf16.mxu0 %v2751_v14  ;;  %v2761_v14 = vld [vmem:[#allocation7 + $0xb0] ss:$12 sps:$4 sm:$0xff]  }
  0xba   : > { %2535 = vmatprep.subr.bf16.mxu1 %v2761_v14 }
  0xbb   : > { %2536 = vmatpush3.bf16.msra.mxu1 %v2761_v14 }
  0xbc   : > { %801 = vmatpush1.bf16.msra.mxu0 %v2753_v15  ;;  %v2762_v15 = vld [vmem:[#allocation7 + $0x98] ss:$12 sps:$4 sm:$0xff]  }
  0xbd   : > { %802 = vmatprep.subr.bf16.mxu0 %v2754_v16  ;;  %2537 = vmatprep.subr.bf16.mxu1 %v2762_v15  ;;  %v2763_v16 = vld [vmem:[#allocation7 + $0x80] ss:$12 sps:$4 sm:$0xff]  }
  0xbf   : > { %2538 = vmatpush3.bf16.msra.mxu1 %v2762_v15 }
  0xc0   : > { %803 = vmatpush1.bf16.msra.mxu0 %v2756_v17  ;;  %2539 = vmatprep.subr.bf16.mxu1 %v2763_v16  ;;  %v2764_v17 = vld [vmem:[#allocation7 + $0x68] ss:$12 sps:$4 sm:$0xff]  }
  0xc3   : > { %821 = vmatmul.mubr.bf16.vlgmr.msra.gmra.mxu0 %v3466_v8  ;;  %2540 = vmatpush3.bf16.msra.mxu1 %v2763_v16 }
  0xc4   : > { %830 = vmatprep.mubr.bf16.mxu0 %v3171_v0  ;;  %2541 = vmatprep.subr.bf16.mxu1 %v2764_v17 }
  0xc7   : > { %2542 = vmatpush3.bf16.msra.mxu1 %v2764_v17 }
  0xc8   : > { %2543 = vmatprep.subr.bf16.mxu1 %v2765_v21 }
  0xcb   : > { %831 = vmatmul.mubr.bf16.gmra.mxu0 %v3470_v18  ;;  %2544 = vmatpush3.bf16.msra.mxu1 %v2765_v21 }
  0xcc   : > { %840 = vmatprep.mubr.bf16.mxu0 %v3171_v0 }
  0xd3   : > { %841 = vmatmul.mubr.bf16.gmra.mxu0 %v3477_v19 }
  0xd4   : > { %850 = vmatprep.mubr.bf16.mxu0 %v3171_v0 }
  0xdb   : > { %851 = vmatmul.mubr.bf16.gmra.mxu0 %v3482_v20 }
 0x183   : > { %v822_v26 = vpop.f32.mrf.mxu0 }
 0x184   : > { %v823_v28 = vadd.f32 %v822_v26, %v624_v25  ;;  %v2767_v26 = vld [vmem:[#allocation7 + $0x20] ss:$12 sps:$4 sm:$0xff]  }
 0x185   : > { %v824_v27 = vpop.f32.mrf.mxu0 }
 0x186   : > { %v926_v32 = vmul.f32 0.088388346, %v823_v28  ;;  %v825_v59 = vadd.f32 %v824_v27, %v628_v47  ;;  %v2768_v27 = vld [vmem:[#allocation7 + $0x8] ss:$12 sps:$4 sm:$0xff]   ;;  %v946_v28 = vld [vmem:[%s513_s24] sm:$0x1] }
 0x187   : > { %v826_v29 = vpop.f32.mrf.mxu0  ;;  %vm947_vm0 = vcmp.gt.s32.totalorder %v946_v28, 0  ;;  %s577_s24 = scalar_lea.vmem [#allocation13], %s2325_s26  ;;  %s3938_s26 = sld [smem:[#allocation24_spill]] }
 0x188   : > { %v827_v30 = vadd.f32 %v826_v29, %v624_v25  ;;  %v3172_v29 = vmov -1e+09   ;;  %s2182_s22 = sshll.u32 %s577_s24, 4  ;;  %s3827_s22 = int_to_ptr.vmem [resolvable:$true] %s2182_s22 }
 0x189   : > { %v828_v31 = vpop.f32.mrf.mxu0  ;;  %s3077_s28 = scalar_lea.vmem %s3827_s22, 512  ;;  %p3084_p4 = scmp.lt.s32.totalorder %s3827_s22, %s3082_s20 }
 0x18a   : > { %v927_v33 = vmul.f32 0.088388346, %v827_v30  ;;  %v829_v58 = vadd.f32 %v828_v31, %v628_v47  ;;  %v948_v30 = vsel %vm947_vm0, 0.0, %v3172_v29  ;;  %p3078_p10 = scmp.ne.s32.totalorder %s3827_s22, %s3077_s28  ;;  %p3085_p0 = scmp.lt.s32.totalorder %s3083_s0, %s3077_s28 }
 0x18b   : > { %v832_v34 = vpop.f32.mrf.mxu0  ;;  %v953_v31 = vrot.slane %v948_v30, %v3488_v23 }
 0x18c   : > { %v934_v35 = vpack.c.bf16 %v927_v33, %v926_v32  ;;  %v938_v60 = vpack.c.bf16 %v829_v58, %v825_v59  ;;  %v833_v63 = vadd.f32 %v832_v34, %v624_v25  ;;  %v631_v59 = vsub.s32 2, %v3485_v22  ;;  %p3086_p3 = por %p3085_p0, %p3084_p4 }
 0x18d   : > { %v834_v36 = vpop.f32.mrf.mxu0  ;;  %p3941_p1 = scmp.ne.s32.totalorder %s3938_s26, 0 }
 0x18e   : > { %2567 = vmatprep.mubr.bf16.mxu0 %v934_v35  ;;  %v835_v56 = vadd.f32 %v834_v36, %v628_v47  ;;  %v928_v4 = vmul.f32 0.088388346, %v833_v63 }
 0x18f   : > { %v836_v37 = vpop.f32.mrf.mxu0  ;;  %p3079_p6 = pnand %p3078_p10, %p3941_p1 }
 0x190   : > { %v837_v61 = vadd.f32 %v836_v37, %v624_v25 }
 0x191   : > { %v838_v38 = vpop.f32.mrf.mxu0  ;;  %p3080_p12 = pneg %p3079_p6 }
 0x192   : > { %v839_v55 = vadd.f32 %v838_v38, %v628_v47  ;;  %v929_v2 = vmul.f32 0.088388346, %v837_v61 }
 0x193   : > { %v842_v39 = vpop.f32.mrf.mxu0  ;;  %p3087_p2 = pnand %p3086_p3, %p3080_p12 }
 0x194   : > { %v939_v57 = vpack.c.bf16 %v839_v55, %v835_v56  ;;  %v843_v1 = vadd.f32 %v842_v39, %v624_v25  ;;  %v935_v6 = vpack.c.bf16 %v929_v2, %v928_v4 }
 0x195   : > { %v844_v40 = vpop.f32.mrf.mxu0 }
 0x196   : > { %v845_v52 = vadd.f32 %v844_v40, %v628_v47  ;;  %v930_v5 = vmul.f32 0.088388346, %v843_v1 }
 0x197   : > { %v846_v41 = vpop.f32.mrf.mxu0 }
 0x198   : > { %v847_v62 = vadd.f32 %v846_v41, %v624_v25 }
 0x199   : > { %v848_v42 = vpop.f32.mrf.mxu0 }
 0x19a   : > { %v849_v49 = vadd.f32 %v848_v42, %v628_v47  ;;  %v931_v3 = vmul.f32 0.088388346, %v847_v62  ;;  %v632_v62 = vrot.slane %v3493_v24, %v631_v59 }
 0x19b   : > { %v852_v43 = vpop.f32.mrf.mxu0 }
 0x19c   : > { %v940_v54 = vpack.c.bf16 %v849_v49, %v845_v52  ;;  %v936_v9 = vpack.c.bf16 %v931_v3, %v930_v5  ;;  %v853_v10 = vadd.f32 %v852_v43, %v624_v25 }
 0x19d   : > { %v854_v45 = vpop.f32.mrf.mxu0 }
 0x19e   : > { %v855_v50 = vadd.f32 %v854_v45, %v628_v47  ;;  %v932_v12 = vmul.f32 0.088388346, %v853_v10 }
 0x19f   : > { %v856_v46 = vpop.f32.mrf.mxu0 }
 0x1a0   : > { %v857_v7 = vadd.f32 %v856_v46, %v624_v25  ;;  %v2766_v25 = vld [vmem:[#allocation7 + $0x38] ss:$12 sps:$4 sm:$0xff]  }
 0x1a1   : > { %v858_v48 = vpop.f32.mrf.mxu0  ;;  %2545 = vmatprep.subr.bf16.mxu1 %v2766_v25 }
 0x1a2   : > { %v859_v51 = vadd.f32 %v858_v48, %v628_v47  ;;  %v933_v11 = vmul.f32 0.088388346, %v857_v7  ;;  %2546 = vmatpush3.bf16.msra.mxu1 %v2766_v25 }
 0x1a3   : > { %2547 = vmatprep.subr.bf16.mxu1 %v2767_v26 }
 0x1a4   : > { %v941_v53 = vpack.c.bf16 %v859_v51, %v855_v50  ;;  %v937_v13 = vpack.c.bf16 %v933_v11, %v932_v12 }
 0x1a6   : > { %2559 = vmatprep.subr.bf16.mxu0 %v941_v53  ;;  %2548 = vmatpush3.bf16.msra.mxu1 %v2767_v26 }
 0x1a7   : > { %2560 = vmatpush3.bf16.xpose.msra.mxu0 %v941_v53  ;;  %2549 = vmatprep.subr.bf16.mxu1 %v2768_v27 }
 0x1a8   : > { %2561 = vmatprep.subr.bf16.mxu0 %v940_v54 }
 0x1aa   : > { %2550 = vmatpush3.bf16.msra.mxu1 %v2768_v27 }
 0x1ad   : > { %2552 = vmatmul.mubr.bf16.vlgmr.msra.gmra.mxu1 %v3470_v18 }
 0x1ae   : > { %2555 = vmatprep.mubr.bf16.mxu1 %v3477_v19 }
 0x1af   : > { %2562 = vmatpush3.bf16.xpose.msra.mxu0 %v940_v54 }
 0x1b0   : > { %2563 = vmatprep.subr.bf16.mxu0 %v939_v57 }
 0x1b5   : > { %2556 = vmatmul.mubr.bf16.gmra.mxu1 %v3482_v20 }
 0x1b7   : > { %2564 = vmatpush3.bf16.xpose.msra.mxu0 %v939_v57 }
 0x1b8   : > { %2565 = vmatprep.subr.bf16.mxu0 %v938_v60 }
 0x1bf   : > { %2566 = vmatpush3.bf16.xpose.msra.mxu0 %v938_v60 }
 0x1c6   : > { %2568 = vmatmul.mubr.bf16.vlgmr.msra.gmra.mxu0 %v935_v6 }
 0x1c7   : > { %2571 = vmatprep.mubr.bf16.mxu0 %v936_v9 }
 0x1ce   : > { %2572 = vmatmul.mubr.bf16.gmra.mxu0 %v937_v13 }
 0x1cf   : > { %1609 = vmatprep.mubr.bf16.mxu0 %v3171_v0 }
 0x26d   : > { %v2553_v57 = vpop.f32.mrf.mxu1 }
 0x26e   : > { %v904_v7 = vadd.f32 %v2553_v57, %v632_v62 }
 0x26f   : > { %v895_v58 = vpop.f32.mrf.mxu1 }
 0x270   : > { %v896_v13 = vadd.f32 %v895_v58, %v632_v62 }
 0x271   : > { %v2554_v60 = vpop.f32.mrf.mxu1 }
 0x272   : > { %v907_v9 = vadd.f32 %v2554_v60, %v632_v62 }
 0x273   : > { %v898_v61 = vpop.f32.mrf.mxu1 }
 0x274   : > { %v943_v14 = vpack.c.bf16 %v907_v9, %v904_v7  ;;  %v899_v15 = vadd.f32 %v898_v61, %v632_v62 }
 0x275   : > { %v2557_v63 = vpop.f32.mrf.mxu1 }
 0x276   : > { %v920_v2 = vadd.f32 %v2557_v63, %v632_v62  ;;  %v942_v21 = vpack.c.bf16 %v899_v15, %v896_v13  ;;  %v2769_v63 = vld [vmem:[#allocation8 + $0x38] sm:$0xff]  }
 0x277   : > { %v911_v1 = vpop.f32.mrf.mxu1 }
 0x278   : > { %v912_v4 = vadd.f32 %v911_v1, %v632_v62 }
 0x279   : > { %v2558_v3 = vpop.f32.mrf.mxu1 }
 0x27a   : > { %v923_v5 = vadd.f32 %v2558_v3, %v632_v62 }
 0x27b   : > { %v914_v6 = vpop.f32.mrf.mxu1 }
 0x27c   : > { %v945_v10 = vpack.c.bf16 %v923_v5, %v920_v2  ;;  %v915_v11 = vadd.f32 %v914_v6, %v632_v62 }
 0x27e   : > { %v944_v12 = vpack.c.bf16 %v915_v11, %v912_v4  ;;  %2575 = vmatprep.subr.bf16.mxu1 %v945_v10 }
 0x27f   : > { %2576 = vmatpush3.bf16.msra.mxu1 %v945_v10 }
 0x280   : > { %2577 = vmatprep.subr.bf16.mxu1 %v944_v12 }
 0x283   : > { %2578 = vmatpush3.bf16.msra.mxu1 %v944_v12 }
 0x284   : > { %2579 = vmatprep.subr.bf16.mxu1 %v943_v14 }
 0x286   : > { %v2569_v32 = vpop.f32.mrf.mxu0 }
 0x287   : > { %v3508_v33 = vadd.f32 %v2569_v32, %v953_v31  ;;  %2580 = vmatpush3.bf16.msra.mxu1 %v943_v14 }
 0x288   : > { %v989_v34 = vpop.f32.mrf.mxu0  ;;  %2581 = vmatprep.subr.bf16.mxu1 %v942_v21 }
 0x289   : > { %v990_v35 = vadd.f32 %v989_v34, %v953_v31  ;;  %v1027_v36 = vsel %vm1020_vm1, %v3508_v33, -inf }
 0x28a   : > { %1028 = vmax.xlane.f32.xlu1 %v1027_v36  ;;  %v2570_v37 = vpop.f32.mrf.mxu0 }
 0x28b   : > { %v3512_v38 = vadd.f32 %v2570_v37, %v953_v31  ;;  %v1021_v39 = vsel %vm1020_vm1, %v990_v35, -inf  ;;  %2582 = vmatpush3.bf16.msra.mxu1 %v942_v21 }
 0x28c   : > { %v992_v40 = vpop.f32.mrf.mxu0  ;;  %1022 = vmax.xlane.f32.xlu0 %v1021_v39  ;;  %2591 = vmatprep.subr.bf16.mxu1 %v2769_v63 }
 0x28d   : > { %v3515_v41 = vadd.f32 %v992_v40, %v953_v31  ;;  %v1030_v42 = vsel %vm1020_vm1, %v3512_v38, -inf }
 0x28e   : > { %1031 = vmax.xlane.f32.xlu1 %v1030_v42  ;;  %v2573_v43 = vpop.f32.mrf.mxu0 }
 0x28f   : > { %v1024_v45 = vsel %vm1020_vm1, %v3515_v41, -inf  ;;  %v3521_v49 = vadd.f32 %v2573_v43, %v953_v31 }
 0x290   : > { %v1005_v46 = vpop.f32.mrf.mxu0  ;;  %1025 = vmax.xlane.f32.xlu0 %v1024_v45 }
 0x291   : > { %v1006_v47 = vadd.f32 %v1005_v46, %v953_v31  ;;  %v1039_v55 = vsel %vm1020_vm1, %v3521_v49, -inf }
 0x292   : > { %v2574_v48 = vpop.f32.mrf.mxu0 }
 0x293   : > { %v1033_v50 = vsel %vm1020_vm1, %v1006_v47, -inf  ;;  %v3524_v53 = vadd.f32 %v2574_v48, %v953_v31 }
 0x294   : > { %v1008_v51 = vpop.f32.mrf.mxu0  ;;  %1034 = vmax.xlane.f32.xlu0 %v1033_v50 }
 0x295   : > { %v1009_v52 = vadd.f32 %v1008_v51, %v953_v31  ;;  %v1042_v56 = vsel %vm1020_vm1, %v3524_v53, -inf }
 0x297   : > { %v1036_v54 = vsel %vm1020_vm1, %v1009_v52, -inf }
 0x298   : > { %1037 = vmax.xlane.f32.xlu1 %v1036_v54  ;;  %1040 = vmax.xlane.f32.xlu0 %v1039_v55 }
 0x29c   : > { %1043 = vmax.xlane.f32.xlu1 %v1042_v56 }
 0x313   : > { %v1029_v16 = vpop.xlane.xlu1 %1028 }
 0x314   : > { %v1047_v24 = vsub.f32 %v3508_v33, %v1029_v16 }
 0x315   : > { %v1023_v17 = vpop.xlane.xlu0 %1022 }
 0x316   : > { %v1045_v25 = vsub.f32 %v990_v35, %v1023_v17  ;;  %v1057_v27 = vmul.f32 1.442695, %v1047_v24 }
 0x317   : > { %v1032_v26 = vpop.xlane.xlu1 %1031 }
 0x318   : > { %v1053_v28 = vmul.f32 1.442695, %v1045_v25  ;;  %v1048_v29 = vsub.f32 %v3512_v38, %v1032_v26  ;;  %v2770_v26 = vld [vmem:[#allocation8 + $0x30] sm:$0xff]  }
 0x319   : > { %v1026_v30 = vpop.xlane.xlu0 %1025 }
 0x31a   : > { %2821 = vpow2.f32 %v1053_v28  ;;  %v1046_v31 = vsub.f32 %v3515_v41, %v1026_v30  ;;  %v1059_v32 = vmul.f32 1.442695, %v1048_v29 }
 0x31b   : > { %2823 = vpow2.f32 %v1057_v27 }
 0x31c   : > { %v1055_v34 = vmul.f32 1.442695, %v1046_v31 }
 0x31d   : > { %v1035_v33 = vpop.xlane.xlu0 %1034 }
 0x31e   : > { %2825 = vpow2.f32 %v1055_v34  ;;  %v1049_v36 = vsub.f32 %v1006_v47, %v1035_v33 }
 0x31f   : > { %2827 = vpow2.f32 %v1059_v32  ;;  %v2771_v32 = vld [vmem:[#allocation8 + $0x28] sm:$0xff]  }
 0x320   : > { %v1061_v35 = vmul.f32 1.442695, %v1049_v36 }
 0x321   : > { %v1038_v37 = vpop.xlane.xlu1 %1037  ;;  %v1041_v39 = vpop.xlane.xlu0 %1040 }
 0x322   : > { %2829 = vpow2.f32 %v1061_v35  ;;  %v1050_v40 = vsub.f32 %v1009_v52, %v1038_v37  ;;  %v1051_v38 = vsub.f32 %v3521_v49, %v1041_v39  ;;  %v2772_v37 = vld [vmem:[#allocation8 + $0x20] sm:$0xff]   ;;  %v2773_v39 = vld [vmem:[#allocation8 + $0x18] sm:$0xff]  }
 0x324   : > { %v1063_v42 = vmul.f32 1.442695, %v1050_v40  ;;  %v1065_v43 = vmul.f32 1.442695, %v1051_v38  ;;  %v2774_v40 = vld [vmem:[#allocation8 + $0x10] sm:$0xff]   ;;  %v2775_v38 = vld [vmem:[#allocation8 + $0x8] sm:$0xff]  }
 0x325   : > { %v1044_v45 = vpop.xlane.xlu1 %1043 }
 0x326   : > { %2831 = vpow2.f32 %v1063_v42  ;;  %v1052_v41 = vsub.f32 %v3524_v53, %v1044_v45  ;;  %v2776_v42 = vld [vmem:[#allocation8] sm:$0xff]  }
 0x327   : > { %v2822_v46 = vpop.eup %2821  ;;  %2833 = vpow2.f32 %v1065_v43 }
 0x328   : > { %v1067_v48 = vmul.f32 1.442695, %v1052_v41  ;;  %v1069_v50 = vsel %vm1020_vm1, %v2822_v46, 0.0  ;;  %v2824_v47 = vpop.eup %2823 }
 0x329   : > { %1070 = vadd.xlane.f32.xlu0 %v1069_v50  ;;  %v1075_v54 = vsel %vm1020_vm1, %v2824_v47, 0.0 }
 0x32a   : > { %2835 = vpow2.f32 %v1067_v48 }
 0x32b   : > { %v2826_v51 = vpop.eup %2825 }
 0x32c   : > { %v1072_v52 = vsel %vm1020_vm1, %v2826_v51, 0.0  ;;  %v2828_v49 = vpop.eup %2827 }
 0x32d   : > { %1076 = vadd.xlane.f32.xlu0 %v1075_v54  ;;  %1073 = vadd.xlane.f32.xlu1 %v1072_v52  ;;  %v1078_v56 = vsel %vm1020_vm1, %v2828_v49, 0.0 }
 0x32f   : > { %v2830_v55 = vpop.eup %2829 }
 0x330   : > { %v1081_v53 = vsel %vm1020_vm1, %v2830_v55, 0.0 }
 0x331   : > { %1079 = vadd.xlane.f32.xlu1 %v1078_v56  ;;  %1082 = vadd.xlane.f32.xlu0 %v1081_v53  ;;  %v1330_v53 = vunpack.c.l.bf16 %v3466_v8 }
 0x333   : > { %v2832_v57 = vpop.eup %2831 }
 0x334   : > { %v2834_v58 = vpop.eup %2833  ;;  %v1084_v59 = vsel %vm1020_vm1, %v2832_v57, 0.0 }
 0x335   : > { %1085 = vadd.xlane.f32.xlu1 %v1084_v59  ;;  %v1087_v60 = vsel %vm1020_vm1, %v2834_v58, 0.0 }
 0x336   : > { %1088 = vadd.xlane.f32.xlu0 %v1087_v60 }
 0x337   : > { %v2836_v61 = vpop.eup %2835 }
 0x338   : > { %v1090_v62 = vsel %vm1020_vm1, %v2836_v61, 0.0 }
 0x339   : > { %1091 = vadd.xlane.f32.xlu1 %v1090_v62 }
 0x3b2   : > { %v1071_v1 = vpop.xlane.xlu0 %1070 }
 0x3b3   : > { %2837 = vrcp.f32 %v1071_v1  ;;  %v1332_v1 = vunpack.c.l.bf16 %v3470_v18 }
 0x3b6   : > { %v1074_v2 = vpop.xlane.xlu1 %1073  ;;  %v1077_v3 = vpop.xlane.xlu0 %1076 }
 0x3b7   : > { %2839 = vrcp.f32 %v1074_v2 }
 0x3b8   : > { %2841 = vrcp.f32 %v1077_v3 }
 0x3ba   : > { %v1080_v4 = vpop.xlane.xlu1 %1079  ;;  %v1083_v5 = vpop.xlane.xlu0 %1082 }
 0x3bb   : > { %2843 = vrcp.f32 %v1080_v4 }
 0x3bc   : > { %2845 = vrcp.f32 %v1083_v5  ;;  %v1333_v5 = vunpack.c.h.bf16 %v3470_v18 }
 0x3be   : > { %v1086_v6 = vpop.xlane.xlu1 %1085 }
 0x3bf   : > { %2847 = vrcp.f32 %v1086_v6  ;;  %v1089_v7 = vpop.xlane.xlu0 %1088 }
 0x3c0   : > { %2849 = vrcp.f32 %v1089_v7  ;;  %v2838_v9 = vpop.eup %2837 }
 0x3c1   : > { %v1101_v12 = vmul.f32 %v2838_v9, %v2822_v46 }
 0x3c2   : > { %v1092_v10 = vpop.xlane.xlu1 %1091 }
 0x3c3   : > { %2851 = vrcp.f32 %v1092_v10  ;;  %v1334_v10 = vunpack.c.l.bf16 %v3477_v19 }
 0x3c4   : > { %v2840_v11 = vpop.eup %2839 }
 0x3c5   : > { %v1102_v13 = vmul.f32 %v2840_v11, %v2826_v51  ;;  %v2842_v14 = vpop.eup %2841 }
 0x3c6   : > { %v1103_v24 = vmul.f32 %v2842_v14, %v2824_v47 }
 0x3c7   : > { %v1109_v15 = vpack.c.bf16 %v1102_v13, %v1101_v12 }
 0x3c8   : > { %v2844_v16 = vpop.eup %2843 }
 0x3c9   : > { %v1104_v17 = vmul.f32 %v2844_v16, %v2828_v49  ;;  %2583 = vmatprep.mubr.msk.bf16.mxu1 %vm1020_vm1, %v1109_v15  ;;  %v2846_v21 = vpop.eup %2845 }
 0x3ca   : > { %v1105_v28 = vmul.f32 %v2846_v21, %v2830_v55 }
 0x3cb   : > { %v1110_v25 = vpack.c.bf16 %v1104_v17, %v1103_v24  ;;  %v1335_v24 = vunpack.c.h.bf16 %v3477_v19 }
 0x3cc   : > { %v2848_v27 = vpop.eup %2847 }
 0x3cd   : > { %2584 = vmatmul.mubr.msk.bf16.vlgmr.msra.gmra.mxu1 %vm1020_vm1, %v1110_v25  ;;  %v1106_v29 = vmul.f32 %v2848_v27, %v2832_v57  ;;  %v2850_v30 = vpop.eup %2849  ;;  %v2363_v57 = vld [vmem:[%s3875_s5] ss:$0 sm:$0xff]  ;;  %v1337_v27 = vunpack.c.h.bf16 %v3482_v20 }
 0x3ce   : > { %2592 = vmatpush3.bf16.msra.mxu1 %v2769_v63  ;;  %v1107_v33 = vmul.f32 %v2850_v30, %v2834_v58  ;;  %v1331_v63 = vunpack.c.h.bf16 %v3466_v8  ;;  %v1336_v8 = vunpack.c.l.bf16 %v3482_v20  ;;  %v2779_v30 = vld [vmem:[#allocation10 + $0x74] ss:$8 sps:$4 sm:$0xff]  }
 0x3cf   : > { %v1111_v31 = vpack.c.bf16 %v1106_v29, %v1105_v28  ;;  %2593 = vmatprep.subr.bf16.mxu1 %v2770_v26  ;;  %v2777_v29 = vld [vmem:[#allocation10 + $0x70] ss:$8 sps:$4 sm:$0xff]   ;;  %1577 = vmatprep.subr.bf16.mxu0 %v2779_v30 }
 0x3d0   : > { %v2852_v34 = vpop.eup %2851  ;;  %1578 = vmatpush1.bf16.msra.mxu0 %v2777_v29 }
 0x3d1   : > { %2587 = vmatprep.mubr.msk.bf16.mxu1 %vm1020_vm1, %v1111_v31  ;;  %v1108_v36 = vmul.f32 %v2852_v34, %v2836_v61 }
 0x3d2   : > { %2594 = vmatpush3.bf16.msra.mxu1 %v2770_v26 }
 0x3d3   : > { %v1112_v35 = vpack.c.bf16 %v1108_v36, %v1107_v33  ;;  %2595 = vmatprep.subr.bf16.mxu1 %v2771_v32 }
 0x3d5   : > { %2588 = vmatmul.mubr.msk.bf16.gmra.mxu1 %vm1020_vm1, %v1112_v35 }
 0x3d6   : > { %2596 = vmatpush3.bf16.msra.mxu1 %v2771_v32 }
 0x3d7   : > { %2597 = vmatprep.subr.bf16.mxu1 %v2772_v37 }
 0x3da   : > { %2598 = vmatpush3.bf16.msra.mxu1 %v2772_v37 }
 0x3db   : > { %2599 = vmatprep.subr.bf16.mxu1 %v2773_v39 }
 0x3de   : > { %2600 = vmatpush3.bf16.msra.mxu1 %v2773_v39 }
 0x3df   : > { %2601 = vmatprep.subr.bf16.mxu1 %v2774_v40 }
 0x3e2   : > { %2602 = vmatpush3.bf16.msra.mxu1 %v2774_v40 }
 0x3e3   : > { %2603 = vmatprep.subr.bf16.mxu1 %v2775_v38 }
 0x3e6   : > { %2604 = vmatpush3.bf16.msra.mxu1 %v2775_v38 }
 0x3e7   : > { %2605 = vmatprep.subr.bf16.mxu1 %v2776_v42 }
 0x3ea   : > { %2606 = vmatpush3.bf16.msra.mxu1 %v2776_v42 }
 0x48d   : > { %v2585_v43 = vpop.f32.mrf.mxu1 }
 0x48f   : > { %v1159_v45 = vpop.f32.mrf.mxu1 }
 0x491   : > { %v2586_v41 = vpop.f32.mrf.mxu1 }
 0x492   : > { %v1191_v50 = vpack.c.bf16 %v2586_v41, %v2585_v43 }
 0x493   : > { %v1162_v46 = vpop.f32.mrf.mxu1 }
 0x494   : > { %v1190_v48 = vpack.c.bf16 %v1162_v46, %v1159_v45 }
 0x495   : > { %v2589_v47 = vpop.f32.mrf.mxu1 }
 0x496   : > { %2607 = vmatprep.mubr.bf16.mxu1 %v1190_v48 }
 0x497   : > { %v1175_v51 = vpop.f32.mrf.mxu1  ;;  %2608 = vmatmul.mubr.bf16.vlgmr.msra.gmra.mxu1 %v1191_v50 }
 0x499   : > { %v2590_v54 = vpop.f32.mrf.mxu1 }
 0x49a   : > { %v1193_v55 = vpack.c.bf16 %v2590_v54, %v2589_v47 }
 0x49b   : > { %v1178_v52 = vpop.f32.mrf.mxu1 }
 0x49c   : > { %v1192_v49 = vpack.c.bf16 %v1178_v52, %v1175_v51 }
 0x49e   : > { %2611 = vmatprep.mubr.bf16.mxu1 %v1192_v49 }
 0x49f   : > { %2612 = vmatmul.mubr.bf16.gmra.mxu1 %v1193_v55 }
 0x557   : > { %v2609_v56 = vpop.f32.mrf.mxu1 }
 0x558   : > { %v1308_v61 = vadd.f32 %v2609_v56, %v2363_v57 }
 0x559   : > { %v1299_v58 = vpop.f32.mrf.mxu1 }
 0x55a   : > { %v1300_v59 = vadd.f32 %v2363_v57, %v1299_v58  ;;  %v1340_v9 = vadd.f32 %v1332_v1, %v1308_v61  ;;  %v2785_v1 = vld [vmem:[#allocation10 + $0x54] ss:$8 sps:$4 sm:$0xff]  }
 0x55b   : > { %v2610_v60 = vpop.f32.mrf.mxu1 }
 0x55c   : > { %v1338_v62 = vadd.f32 %v1330_v53, %v1300_v59  ;;  %v1311_v6 = vadd.f32 %v2610_v60, %v2363_v57  ;;  %v2782_v60 = vld [vmem:[#allocation10 + $0x64] ss:$8 sps:$4 sm:$0xff]  }
 0x55d   : > { %v1302_v2 = vpop.f32.mrf.mxu1  ;;  %1579 = vmatprep.subr.bf16.mxu0 %v2782_v60 }
 0x55e   : > { %v1303_v3 = vadd.f32 %v2363_v57, %v1302_v2  ;;  %1346 = vadd.xlane.f32.xlu0 %v1338_v62  ;;  %v1341_v15 = vadd.f32 %v1333_v5, %v1311_v6  ;;  %v2783_v2 = vld [vmem:[#allocation10 + $0x50] ss:$8 sps:$4 sm:$0xff]   ;;  %v2791_v5 = vld [vmem:[#allocation10 + $0x34] ss:$8 sps:$4 sm:$0xff]  }
 0x55f   : > { %v2613_v4 = vpop.f32.mrf.mxu1  ;;  %v2789_v6 = vld [vmem:[#allocation10 + $0x30] ss:$8 sps:$4 sm:$0xff]  }
 0x560   : > { %v1339_v7 = vadd.f32 %v1331_v63, %v1303_v3  ;;  %v1324_v14 = vadd.f32 %v2613_v4, %v2363_v57  ;;  %v2788_v3 = vld [vmem:[#allocation10 + $0x44] ss:$8 sps:$4 sm:$0xff]   ;;  %v2786_v4 = vld [vmem:[#allocation10 + $0x40] ss:$8 sps:$4 sm:$0xff]  }
 0x561   : > { %v1315_v11 = vpop.f32.mrf.mxu1 }
 0x562   : > { %v1316_v12 = vadd.f32 %v2363_v57, %v1315_v11  ;;  %1348 = vadd.xlane.f32.xlu1 %v1339_v7  ;;  %1350 = vadd.xlane.f32.xlu0 %v1340_v9  ;;  %v1344_v26 = vadd.f32 %v1336_v8, %v1324_v14  ;;  %v2795_v11 = vld [vmem:[#allocation10 + $0x10] ss:$8 sps:$4 sm:$0xff]  }
 0x563   : > { %v2614_v13 = vpop.f32.mrf.mxu1 }
 0x564   : > { %v1342_v16 = vadd.f32 %v1334_v10, %v1316_v12  ;;  %v1327_v18 = vadd.f32 %v2614_v13, %v2363_v57  ;;  %v2797_v10 = vld [vmem:[#allocation10 + $0x14] ss:$8 sps:$4 sm:$0xff]   ;;  %v2800_v12 = vld [vmem:[#allocation10 + $0x4] ss:$8 sps:$4 sm:$0xff]   ;;  %v2798_v13 = vld [vmem:[#allocation10] ss:$8 sps:$4 sm:$0xff]  }
 0x565   : > { %v1318_v17 = vpop.f32.mrf.mxu1 }
 0x566   : > { %v1319_v21 = vadd.f32 %v2363_v57, %v1318_v17  ;;  %1352 = vadd.xlane.f32.xlu1 %v1341_v15  ;;  %1354 = vadd.xlane.f32.xlu0 %v1342_v16  ;;  %v1345_v28 = vadd.f32 %v1337_v27, %v1327_v18 }
 0x568   : > { %v1343_v25 = vadd.f32 %v1335_v24, %v1319_v21 }
 0x56a   : > { %1356 = vadd.xlane.f32.xlu1 %v1343_v25  ;;  %1358 = vadd.xlane.f32.xlu0 %v1344_v26 }
 0x56e   : > { %1360 = vadd.xlane.f32.xlu1 %v1345_v28 }
 0x5e7   : > { %v1347_v31 = vpop.xlane.xlu0 %1346 }
 0x5e8   : > { %v1363_v32 = vmul.f32 0.0078125, %v1347_v31 }
 0x5ea   : > { %v3561_v19 = vsub.f32 %v1338_v62, %v1363_v32  ;;  %v2780_v62 = vld [vmem:[#allocation10 + $0x60] ss:$8 sps:$4 sm:$0xff]  }
 0x5eb   : > { %v1349_v34 = vpop.xlane.xlu1 %1348  ;;  %v1351_v33 = vpop.xlane.xlu0 %1350  ;;  %1580 = vmatpush1.bf16.msra.mxu0 %v2780_v62 }
 0x5ec   : > { %v1364_v36 = vmul.f32 0.0078125, %v1349_v34  ;;  %v1365_v35 = vmul.f32 0.0078125, %v1351_v33  ;;  %v1379_v37 = vmul.f32 %v3561_v19, %v3561_v19  ;;  %1581 = vmatprep.subr.bf16.mxu0 %v2785_v1 }
 0x5ee   : > { %v3565_v20 = vsub.f32 %v1339_v7, %v1364_v36  ;;  %v3567_v39 = vsub.f32 %v1340_v9, %v1365_v35  ;;  %1387 = vadd.xlane.f32.xlu0 %v1379_v37  ;;  %v2794_v7 = vld [vmem:[#allocation10 + $0x24] ss:$8 sps:$4 sm:$0xff]   ;;  %v2792_v9 = vld [vmem:[#allocation10 + $0x20] ss:$8 sps:$4 sm:$0xff]  }
 0x5ef   : > { %v1353_v40 = vpop.xlane.xlu1 %1352  ;;  %v1355_v38 = vpop.xlane.xlu0 %1354  ;;  %1582 = vmatpush1.bf16.msra.mxu0 %v2783_v2 }
 0x5f0   : > { %v1366_v42 = vmul.f32 0.0078125, %v1353_v40  ;;  %v1367_v43 = vmul.f32 0.0078125, %v1355_v38  ;;  %v1380_v45 = vmul.f32 %v3565_v20, %v3565_v20  ;;  %v1381_v41 = vmul.f32 %v3567_v39, %v3567_v39  ;;  %1583 = vmatprep.subr.bf16.mxu0 %v2788_v3 }
 0x5f2   : > { %v3573_v46 = vsub.f32 %v1341_v15, %v1366_v42  ;;  %v3575_v48 = vsub.f32 %v1342_v16, %v1367_v43  ;;  %1389 = vadd.xlane.f32.xlu1 %v1380_v45  ;;  %1391 = vadd.xlane.f32.xlu0 %v1381_v41  ;;  %v2372_v43 = vld [vmem:[%s3876_s6] ss:$0 sm:$0xff] }
 0x5f3   : > { %v1357_v50 = vpop.xlane.xlu1 %1356  ;;  %v1359_v47 = vpop.xlane.xlu0 %1358  ;;  %1584 = vmatpush1.bf16.msra.mxu0 %v2786_v4 }
 0x5f4   : > { %v1368_v51 = vmul.f32 0.0078125, %v1357_v50  ;;  %v1369_v54 = vmul.f32 0.0078125, %v1359_v47  ;;  %v1382_v52 = vmul.f32 %v3573_v46, %v3573_v46  ;;  %v1383_v49 = vmul.f32 %v3575_v48, %v3575_v48  ;;  %1585 = vmatprep.subr.bf16.mxu0 %v2791_v5 }
 0x5f6   : > { %v3581_v55 = vsub.f32 %v1343_v25, %v1368_v51  ;;  %v3583_v56 = vsub.f32 %v1344_v26, %v1369_v54  ;;  %1393 = vadd.xlane.f32.xlu1 %v1382_v52  ;;  %1395 = vadd.xlane.f32.xlu0 %v1383_v49  ;;  %v2373_v52 = vld [vmem:[%s3877_s7] ss:$0 sm:$0xff] }
 0x5f7   : > { %v1361_v53 = vpop.xlane.xlu1 %1360  ;;  %1586 = vmatpush1.bf16.msra.mxu0 %v2789_v6 }
 0x5f8   : > { %v1370_v57 = vmul.f32 0.0078125, %v1361_v53  ;;  %v1384_v58 = vmul.f32 %v3581_v55, %v3581_v55  ;;  %v1385_v59 = vmul.f32 %v3583_v56, %v3583_v56  ;;  %1587 = vmatprep.subr.bf16.mxu0 %v2794_v7 }
 0x5fa   : > { %v3589_v61 = vsub.f32 %v1345_v28, %v1370_v57  ;;  %1397 = vadd.xlane.f32.xlu1 %v1384_v58  ;;  %1399 = vadd.xlane.f32.xlu0 %v1385_v59 }
 0x5fb   : > { %1588 = vmatpush1.bf16.msra.mxu0 %v2792_v9 }
 0x5fc   : > { %v1386_v63 = vmul.f32 %v3589_v61, %v3589_v61  ;;  %1589 = vmatprep.subr.bf16.mxu0 %v2797_v10 }
 0x5fe   : > { %1401 = vadd.xlane.f32.xlu1 %v1386_v63 }
 0x5ff   : > { %1590 = vmatpush1.bf16.msra.mxu0 %v2795_v11 }
 0x600   : > { %1591 = vmatprep.subr.bf16.mxu0 %v2800_v12 }
 0x603   : > { %1592 = vmatpush1.bf16.msra.mxu0 %v2798_v13 }
 0x677   : > { %v1388_v8 = vpop.xlane.xlu0 %1387 }
 0x678   : > { %v1403_v14 = vmul.f32 0.0078125, %v1388_v8 }
 0x67a   : > { %v1411_v15 = vadd.f32 1e-05, %v1403_v14 }
 0x67b   : > { %v1390_v16 = vpop.xlane.xlu1 %1389  ;;  %v1392_v24 = vpop.xlane.xlu0 %1391 }
 0x67c   : > { %2853 = vrsqrt.f32 %v1411_v15  ;;  %v1404_v17 = vmul.f32 0.0078125, %v1390_v16  ;;  %v1405_v21 = vmul.f32 0.0078125, %v1392_v24  ;;  %v2802_v24 = vld [vmem:[#allocation11 + $0x38] sm:$0xff]  }
 0x67e   : > { %v1412_v18 = vadd.f32 1e-05, %v1404_v17  ;;  %v1413_v25 = vadd.f32 1e-05, %v1405_v21  ;;  %v2804_v17 = vld [vmem:[#allocation11 + $0x30] sm:$0xff]   ;;  %v2806_v21 = vld [vmem:[#allocation11 + $0x28] sm:$0xff]  }
 0x67f   : > { %v1394_v26 = vpop.xlane.xlu1 %1393  ;;  %v1396_v27 = vpop.xlane.xlu0 %1395 }
 0x680   : > { %2855 = vrsqrt.f32 %v1412_v18  ;;  %v1406_v28 = vmul.f32 0.0078125, %v1394_v26  ;;  %v1407_v30 = vmul.f32 0.0078125, %v1396_v27  ;;  %v2807_v18 = vld [vmem:[#allocation11 + $0x60] sm:$0xff]   ;;  %v2809_v26 = vld [vmem:[#allocation11 + $0x58] sm:$0xff]  }
 0x681   : > { %2857 = vrsqrt.f32 %v1413_v25  ;;  %v2808_v25 = vld [vmem:[#allocation11 + $0x20] sm:$0xff]   ;;  %v2810_v27 = vld [vmem:[#allocation11 + $0x18] sm:$0xff]  }
 0x682   : > { %v1414_v29 = vadd.f32 1e-05, %v1406_v28  ;;  %v1415_v34 = vadd.f32 1e-05, %v1407_v30  ;;  %v2811_v28 = vld [vmem:[#allocation11 + $0x50] sm:$0xff]   ;;  %v2813_v30 = vld [vmem:[#allocation11 + $0x48] sm:$0xff]  }
 0x683   : > { %v1398_v31 = vpop.xlane.xlu1 %1397  ;;  %v1400_v36 = vpop.xlane.xlu0 %1399 }
 0x684   : > { %2859 = vrsqrt.f32 %v1414_v29  ;;  %v1408_v32 = vmul.f32 0.0078125, %v1398_v31  ;;  %v1409_v38 = vmul.f32 0.0078125, %v1400_v36  ;;  %v2812_v29 = vld [vmem:[#allocation11 + $0x10] sm:$0xff]   ;;  %v2814_v31 = vld [vmem:[#allocation11 + $0x8] sm:$0xff]  }
 0x686   : > { %v1416_v33 = vadd.f32 1e-05, %v1408_v32  ;;  %v1417_v50 = vadd.f32 1e-05, %v1409_v38  ;;  %v2815_v32 = vld [vmem:[#allocation11 + $0x40] sm:$0xff]  }
 0x687   : > { %v1402_v35 = vpop.xlane.xlu1 %1401 }
 0x688   : > { %2861 = vrsqrt.f32 %v1416_v33  ;;  %v1410_v37 = vmul.f32 0.0078125, %v1402_v35  ;;  %v1485_v33 = vld [vmem:[%s3879_s9] sm:$0x3] }
 0x689   : > { %v2854_v40 = vpop.eup %2853  ;;  %2863 = vrsqrt.f32 %v1415_v34  ;;  %v2816_v34 = vld [vmem:[#allocation11] sm:$0xff]   ;;  %v3638_v36 = vrot.slane %v1485_v33, %v3488_v23  ;;  %v3642_v35 = vrot.slane %v1485_v33, %v627_v44 }
 0x68a   : > { %v1427_v42 = vmul.f32 %v2854_v40, %v3561_v19  ;;  %v1418_v45 = vadd.f32 1e-05, %v1410_v37 }
 0x68c   : > { %v1442_v51 = vmul.f32 %v2372_v43, %v1427_v42  ;;  %2865 = vrsqrt.f32 %v1418_v45 }
 0x68d   : > { %v2856_v41 = vpop.eup %2855  ;;  %2867 = vrsqrt.f32 %v1417_v50 }
 0x68e   : > { %v1428_v47 = vmul.f32 %v2856_v41, %v3565_v20  ;;  %v2858_v54 = vpop.eup %2857  ;;  %v3601_v19 = vadd.f32 %v2373_v52, %v1442_v51 }
 0x68f   : > { %v1429_v58 = vmul.f32 %v2858_v54, %v3567_v39 }
 0x690   : > { %v1443_v49 = vmul.f32 %v2372_v43, %v1428_v47 }
 0x691   : > { %v2860_v53 = vpop.eup %2859  ;;  %v1444_v63 = vmul.f32 %v2372_v43, %v1429_v58 }
 0x692   : > { %v3603_v57 = vadd.f32 %v2373_v52, %v1443_v49  ;;  %v1430_v59 = vmul.f32 %v2860_v53, %v3573_v46 }
 0x693   : > { %v3613_v4 = vadd.f32 %v2373_v52, %v1444_v63 }
 0x694   : > { %v1465_v20 = vpack.c.bf16 %v3603_v57, %v3601_v19  ;;  %v1445_v60 = vmul.f32 %v2372_v43, %v1430_v59 }
 0x695   : > { %v2862_v62 = vpop.eup %2861 }
 0x696   : > { %1610 = vmatmul.mubr.bf16.vlgmr.msra.gmra.mxu0 %v1465_v20  ;;  %v2864_v1 = vpop.eup %2863  ;;  %v3610_v2 = vadd.f32 %v2373_v52, %v1445_v60  ;;  %v1432_v3 = vmul.f32 %v2862_v62, %v3581_v55 }
 0x697   : > { %1619 = vmatprep.mubr.bf16.mxu0 %v3171_v0  ;;  %v1431_v39 = vmul.f32 %v2864_v1, %v3575_v48 }
 0x698   : > { %v1466_v46 = vpack.c.bf16 %v3610_v2, %v3613_v4  ;;  %v1447_v5 = vmul.f32 %v2372_v43, %v1432_v3 }
 0x699   : > { %v2866_v6 = vpop.eup %2865  ;;  %v1446_v9 = vmul.f32 %v2372_v43, %v1431_v39 }
 0x69a   : > { %v2868_v7 = vpop.eup %2867  ;;  %v3619_v10 = vadd.f32 %v2373_v52, %v1447_v5  ;;  %v1434_v11 = vmul.f32 %v2866_v6, %v3589_v61  ;;  %v2801_v61 = vld [vmem:[#allocation11 + $0x78] sm:$0xff]  }
 0x69b   : > { %v3622_v12 = vadd.f32 %v2373_v52, %v1446_v9  ;;  %v1433_v55 = vmul.f32 %v2868_v7, %v3583_v56  ;;  %2495 = vmatprep.subr.bf16.mxu0 %v2801_v61  ;;  %2615 = vmatprep.subr.bf16.mxu1 %v2801_v61  ;;  %v2803_v56 = vld [vmem:[#allocation11 + $0x70] sm:$0xff]  }
 0x69c   : > { %v1449_v13 = vmul.f32 %v2372_v43, %v1434_v11  ;;  %2496 = vmatpush3.bf16.msra.mxu0 %v2802_v24  ;;  %2623 = vmatpush3.bf16.msra.mxu1 %v2802_v24 }
 0x69d   : > { %v1467_v48 = vpack.c.bf16 %v3619_v10, %v3622_v12  ;;  %v1448_v8 = vmul.f32 %v2372_v43, %v1433_v55  ;;  %2497 = vmatprep.subr.bf16.mxu0 %v2803_v56  ;;  %2616 = vmatprep.subr.bf16.mxu1 %v2803_v56 }
 0x69e   : > { %1620 = vmatmul.mubr.bf16.gmra.mxu0 %v1466_v46  ;;  %v3628_v14 = vadd.f32 %v2373_v52, %v1449_v13 }
 0x69f   : > { %1629 = vmatprep.mubr.bf16.mxu0 %v3171_v0  ;;  %v3630_v15 = vadd.f32 %v2373_v52, %v1448_v8 }
 0x6a0   : > { %2498 = vmatpush3.bf16.msra.mxu0 %v2804_v17  ;;  %2624 = vmatpush3.bf16.msra.mxu1 %v2804_v17 }
 0x6a1   : > { %v1468_v16 = vpack.c.bf16 %v3628_v14, %v3630_v15 }
 0x6a6   : > { %1630 = vmatmul.mubr.bf16.gmra.mxu0 %v1467_v48 }
 0x6a7   : > { %1639 = vmatprep.mubr.bf16.mxu0 %v3171_v0  ;;  %v2805_v0 = vld [vmem:[#allocation11 + $0x68] sm:$0xff]  }
 0x6a8   : > { %2499 = vmatprep.subr.bf16.mxu0 %v2805_v0  ;;  %2617 = vmatprep.subr.bf16.mxu1 %v2805_v0 }
 0x6a9   : > { %2500 = vmatpush3.bf16.msra.mxu0 %v2806_v21  ;;  %2625 = vmatpush3.bf16.msra.mxu1 %v2806_v21 }
 0x6aa   : > { %2501 = vmatprep.subr.bf16.mxu0 %v2807_v18  ;;  %2618 = vmatprep.subr.bf16.mxu1 %v2807_v18 }
 0x6ad   : > { %2502 = vmatpush3.bf16.msra.mxu0 %v2808_v25  ;;  %2626 = vmatpush3.bf16.msra.mxu1 %v2808_v25 }
 0x6ae   : > { %1640 = vmatmul.mubr.bf16.gmra.mxu0 %v1468_v16  ;;  %2503 = vmatprep.subr.bf16.mxu0 %v2809_v26 }
 0x6af   : > { %2619 = vmatprep.subr.bf16.mxu1 %v2809_v26 }
 0x6b1   : > { %2504 = vmatpush3.bf16.msra.mxu0 %v2810_v27  ;;  %2627 = vmatpush3.bf16.msra.mxu1 %v2810_v27 }
 0x6b2   : > { %2505 = vmatprep.subr.bf16.mxu0 %v2811_v28  ;;  %2620 = vmatprep.subr.bf16.mxu1 %v2811_v28 }
 0x6b5   : > { %2506 = vmatpush3.bf16.msra.mxu0 %v2812_v29  ;;  %2628 = vmatpush3.bf16.msra.mxu1 %v2812_v29 }
 0x6b6   : > { %2507 = vmatprep.subr.bf16.mxu0 %v2813_v30  ;;  %2621 = vmatprep.subr.bf16.mxu1 %v2813_v30 }
 0x6b9   : > { %2508 = vmatpush3.bf16.msra.mxu0 %v2814_v31  ;;  %2629 = vmatpush3.bf16.msra.mxu1 %v2814_v31 }
 0x6ba   : > { %2509 = vmatprep.subr.bf16.mxu0 %v2815_v32  ;;  %2622 = vmatprep.subr.bf16.mxu1 %v2815_v32 }
 0x6bd   : > { %2510 = vmatpush3.bf16.msra.mxu0 %v2816_v34  ;;  %2630 = vmatpush3.bf16.msra.mxu1 %v2816_v34 }
 0x756   : > { %v1611_v37 = vpop.f32.mrf.mxu0 }
 0x757   : > { %v3645_v40 = vadd.f32 %v1611_v37, %v3638_v36 }
 0x758   : > { %v1613_v38 = vpop.f32.mrf.mxu0 }
 0x759   : > { %v1650_v42 = vmul.f32 %v3645_v40, %v3645_v40  ;;  %v3650_v43 = vadd.f32 %v1613_v38, %v3642_v35 }
 0x75a   : > { %v1615_v45 = vpop.f32.mrf.mxu0 }
 0x75b   : > { %v1666_v41 = vmul.f32 %v1650_v42, %v3645_v40  ;;  %v1651_v23 = vmul.f32 %v3650_v43, %v3650_v43  ;;  %v3656_v22 = vadd.f32 %v1615_v45, %v3638_v36 }
 0x75c   : > { %v1617_v44 = vpop.f32.mrf.mxu0 }
 0x75d   : > { %v1682_v50 = vmul.f32 0.044715, %v1666_v41  ;;  %v1667_v47 = vmul.f32 %v1651_v23, %v3650_v43  ;;  %v1652_v51 = vmul.f32 %v3656_v22, %v3656_v22  ;;  %v3662_v54 = vadd.f32 %v1617_v44, %v3642_v35 }
 0x75e   : > { %v1621_v52 = vpop.f32.mrf.mxu0 }
 0x75f   : > { %v1698_v49 = vadd.f32 %v1682_v50, %v3645_v40  ;;  %v1683_v53 = vmul.f32 0.044715, %v1667_v47  ;;  %v1668_v58 = vmul.f32 %v1652_v51, %v3656_v22  ;;  %v1653_v59 = vmul.f32 %v3662_v54, %v3662_v54 }
 0x760   : > { %v3669_v20 = vadd.f32 %v1621_v52, %v3638_v36  ;;  %v1623_v60 = vpop.f32.mrf.mxu0 }
 0x761   : > { %v1714_v62 = vmul.f32 0.7978846, %v1698_v49  ;;  %v1699_v63 = vadd.f32 %v1683_v53, %v3650_v43  ;;  %v1684_v1 = vmul.f32 0.044715, %v1668_v58  ;;  %v1669_v3 = vmul.f32 %v1653_v59, %v3662_v54 }
 0x762   : > { %v1654_v39 = vmul.f32 %v3669_v20, %v3669_v20  ;;  %v3676_v46 = vadd.f32 %v1623_v60, %v3642_v35  ;;  %v1625_v5 = vpop.f32.mrf.mxu0 }
 0x763   : > { %2869 = vtanh.f32 %v1714_v62  ;;  %v1715_v6 = vmul.f32 0.7978846, %v1699_v63  ;;  %v1700_v7 = vadd.f32 %v1684_v1, %v3656_v22  ;;  %v1685_v9 = vmul.f32 0.044715, %v1669_v3 }
 0x764   : > { %v1670_v11 = vmul.f32 %v1654_v39, %v3669_v20  ;;  %v1655_v55 = vmul.f32 %v3676_v46, %v3676_v46  ;;  %v3683_v48 = vadd.f32 %v1625_v5, %v3638_v36  ;;  %v1627_v13 = vpop.f32.mrf.mxu0 }
 0x765   : > { %v1716_v8 = vmul.f32 0.7978846, %v1700_v7  ;;  %v1701_v16 = vadd.f32 %v1685_v9, %v3662_v54  ;;  %v3687_v61 = vadd.f32 %v1627_v13, %v3642_v35  ;;  %2871 = vtanh.f32 %v1715_v6 }
 0x766   : > { %v1686_v24 = vmul.f32 0.044715, %v1670_v11  ;;  %v1671_v56 = vmul.f32 %v1655_v55, %v3676_v46  ;;  %v1656_v17 = vmul.f32 %v3683_v48, %v3683_v48  ;;  %v1631_v0 = vpop.f32.mrf.mxu0 }
 0x767   : > { %2873 = vtanh.f32 %v1716_v8  ;;  %v1717_v21 = vmul.f32 0.7978846, %v1701_v16  ;;  %v1657_v18 = vmul.f32 %v3687_v61, %v3687_v61  ;;  %v3695_v25 = vadd.f32 %v1631_v0, %v3638_v36 }
 0x768   : > { %v1702_v26 = vadd.f32 %v1686_v24, %v3669_v20  ;;  %v1687_v27 = vmul.f32 0.044715, %v1671_v56  ;;  %v1672_v28 = vmul.f32 %v1656_v17, %v3683_v48  ;;  %v1633_v29 = vpop.f32.mrf.mxu0 }
 0x769   : > { %2875 = vtanh.f32 %v1717_v21  ;;  %v1673_v30 = vmul.f32 %v1657_v18, %v3687_v61  ;;  %v1658_v31 = vmul.f32 %v3695_v25, %v3695_v25  ;;  %v3703_v32 = vadd.f32 %v1633_v29, %v3642_v35 }
 0x76a   : > { %v1718_v34 = vmul.f32 0.7978846, %v1702_v26  ;;  %v1703_v33 = vadd.f32 %v1687_v27, %v3676_v46  ;;  %v1688_v37 = vmul.f32 0.044715, %v1672_v28  ;;  %v1635_v38 = vpop.f32.mrf.mxu0 }
 0x76b   : > { %v1689_v42 = vmul.f32 0.044715, %v1673_v30  ;;  %v1674_v45 = vmul.f32 %v1658_v31, %v3695_v25  ;;  %v1659_v41 = vmul.f32 %v3703_v32, %v3703_v32  ;;  %v3710_v23 = vadd.f32 %v1635_v38, %v3638_v36 }
 0x76c   : > { %2877 = vtanh.f32 %v1718_v34  ;;  %v1719_v44 = vmul.f32 0.7978846, %v1703_v33  ;;  %v1704_v50 = vadd.f32 %v1688_v37, %v3683_v48  ;;  %v1637_v47 = vpop.f32.mrf.mxu0 }
 0x76d   : > { %v1705_v51 = vadd.f32 %v1689_v42, %v3687_v61  ;;  %v1690_v52 = vmul.f32 0.044715, %v1674_v45  ;;  %v1675_v49 = vmul.f32 %v1659_v41, %v3703_v32  ;;  %v1660_v53 = vmul.f32 %v3710_v23, %v3710_v23 }
 0x76e   : > { %2879 = vtanh.f32 %v1719_v44  ;;  %v1720_v58 = vmul.f32 0.7978846, %v1704_v50  ;;  %v3718_v59 = vadd.f32 %v1637_v47, %v3642_v35  ;;  %v1641_v60 = vpop.f32.mrf.mxu0 }
 0x76f   : > { %v1721_v62 = vmul.f32 0.7978846, %v1705_v51  ;;  %v1706_v63 = vadd.f32 %v1690_v52, %v3695_v25  ;;  %v1691_v1 = vmul.f32 0.044715, %v1675_v49  ;;  %v1676_v3 = vmul.f32 %v1660_v53, %v3710_v23 }
 0x770   : > { %v2870_v39 = vpop.eup %2869  ;;  %2881 = vtanh.f32 %v1720_v58  ;;  %v1661_v5 = vmul.f32 %v3718_v59, %v3718_v59  ;;  %v3725_v6 = vadd.f32 %v1641_v60, %v3638_v36  ;;  %v1643_v7 = vpop.f32.mrf.mxu0 }
 0x771   : > { %v1746_v9 = vadd.f32 1.0, %v2870_v39  ;;  %2883 = vtanh.f32 %v1721_v62  ;;  %v1722_v11 = vmul.f32 0.7978846, %v1706_v63  ;;  %v1707_v55 = vadd.f32 %v1691_v1, %v3703_v32 }
 0x772   : > { %v1692_v13 = vmul.f32 0.044715, %v1676_v3  ;;  %v1677_v8 = vmul.f32 %v1661_v5, %v3718_v59  ;;  %v1662_v16 = vmul.f32 %v3725_v6, %v3725_v6  ;;  %v3732_v24 = vadd.f32 %v1643_v7, %v3642_v35  ;;  %v1645_v56 = vpop.f32.mrf.mxu0  ;;  %v2872_v17 = vpop.eup %2871 }
 0x773   : > { %2885 = vtanh.f32 %v1722_v11  ;;  %v1723_v0 = vmul.f32 0.7978846, %v1707_v55  ;;  %v3735_v21 = vadd.f32 %v1645_v56, %v3638_v36  ;;  %v1762_v31 = vmul.f32 0.5, %v1746_v9 }
 0x774   : > { %v2874_v18 = vpop.eup %2873  ;;  %v1708_v26 = vadd.f32 %v1692_v13, %v3710_v23  ;;  %v1693_v27 = vmul.f32 0.044715, %v1677_v8  ;;  %v1678_v28 = vmul.f32 %v1662_v16, %v3725_v6  ;;  %v1663_v29 = vmul.f32 %v3732_v24, %v3732_v24  ;;  %v1647_v30 = vpop.f32.mrf.mxu0 }
 0x775   : > { %v1748_v34 = vadd.f32 1.0, %v2874_v18  ;;  %2887 = vtanh.f32 %v1723_v0  ;;  %v1664_v33 = vmul.f32 %v3735_v21, %v3735_v21  ;;  %v3747_v50 = vadd.f32 %v1647_v30, %v3642_v35 }
 0x776   : > { %v2876_v37 = vpop.eup %2875  ;;  %v1724_v38 = vmul.f32 0.7978846, %v1708_v26  ;;  %v1709_v36 = vadd.f32 %v1693_v27, %v3718_v59  ;;  %v1694_v42 = vmul.f32 0.044715, %v1678_v28  ;;  %v1679_v45 = vmul.f32 %v1663_v29, %v3732_v24 }
 0x777   : > { %v1764_v41 = vmul.f32 0.5, %v1748_v34  ;;  %v1680_v44 = vmul.f32 %v1664_v33, %v3735_v21  ;;  %v1747_v47 = vadd.f32 1.0, %v2872_v17  ;;  %v1665_v60 = vmul.f32 %v3747_v50, %v3747_v50 }
 0x778   : > { %2889 = vtanh.f32 %v1724_v38  ;;  %v1725_v51 = vmul.f32 0.7978846, %v1709_v36  ;;  %v1710_v52 = vadd.f32 %v1694_v42, %v3725_v6  ;;  %v1695_v49 = vmul.f32 0.044715, %v1679_v45 }
 0x779   : > { %v2878_v53 = vpop.eup %2877  ;;  %v1696_v58 = vmul.f32 0.044715, %v1680_v44  ;;  %v1749_v62 = vadd.f32 1.0, %v2876_v37  ;;  %v1778_v35 = vmul.f32 %v1762_v31, %v3645_v40  ;;  %v1681_v5 = vmul.f32 %v1665_v60, %v3747_v50 }
 0x77a   : > { %2891 = vtanh.f32 %v1725_v51  ;;  %v1726_v63 = vmul.f32 0.7978846, %v1710_v52  ;;  %v1711_v1 = vadd.f32 %v1695_v49, %v3732_v24  ;;  %v1763_v7 = vmul.f32 0.5, %v1747_v47 }
 0x77b   : > { %v2880_v3 = vpop.eup %2879  ;;  %v1712_v39 = vadd.f32 %v1696_v58, %v3735_v21  ;;  %v1780_v9 = vmul.f32 %v1764_v41, %v3656_v22  ;;  %v1750_v11 = vadd.f32 1.0, %v2878_v53  ;;  %v1765_v13 = vmul.f32 0.5, %v1749_v62 }
 0x77c   : > { %v1727_v55 = vmul.f32 0.7978846, %v1711_v1  ;;  %2893 = vtanh.f32 %v1726_v63  ;;  %v1697_v56 = vmul.f32 0.044715, %v1681_v5  ;;  %v1751_v17 = vadd.f32 1.0, %v2880_v3 }
 0x77d   : > { %v2882_v8 = vpop.eup %2881  ;;  %v1728_v16 = vmul.f32 0.7978846, %v1712_v39  ;;  %v1779_v40 = vmul.f32 %v1763_v7, %v3650_v43  ;;  %v1781_v26 = vmul.f32 %v1765_v13, %v3662_v54  ;;  %v1766_v30 = vmul.f32 0.5, %v1750_v11 }
 0x77e   : > { %v2884_v0 = vpop.eup %2883  ;;  %v1752_v18 = vadd.f32 1.0, %v2882_v8  ;;  %2895 = vtanh.f32 %v1727_v55  ;;  %v1713_v27 = vadd.f32 %v1697_v56, %v3747_v50  ;;  %v1767_v22 = vmul.f32 0.5, %v1751_v17 }
 0x77f   : > { %2897 = vtanh.f32 %v1728_v16  ;;  %v1753_v28 = vadd.f32 1.0, %v2884_v0  ;;  %v1795_v34 = vpack.c.bf16 %v1781_v26, %v1779_v40  ;;  %v1794_v33 = vpack.c.bf16 %v1780_v9, %v1778_v35 }
 0x780   : > { %v2886_v29 = vpop.eup %2885  ;;  %v1768_v31 = vmul.f32 0.5, %v1752_v18  ;;  %v1729_v37 = vmul.f32 0.7978846, %v1713_v27  ;;  %v1783_v43 = vmul.f32 %v1767_v22, %v3676_v46  ;;  %v1782_v45 = vmul.f32 %v1766_v30, %v3669_v20  ;;  %v2390_v27 = vld [vmem:[%s3881_s11] ss:$0 sm:$0xff] }
 0x781   : > { %v1769_v38 = vmul.f32 0.5, %v1753_v28  ;;  %1969 = vmatprep.mubr.bf16.mxu0 %v1795_v34  ;;  %v1754_v51 = vadd.f32 1.0, %v2886_v29 }
 0x782   : > { %v2888_v36 = vpop.eup %2887  ;;  %v1784_v42 = vmul.f32 %v1768_v31, %v3683_v48  ;;  %2899 = vtanh.f32 %v1729_v37  ;;  %1970 = vmatmul.mubr.bf16.vlgmr.msra.gmra.mxu0 %v1794_v33 }
 0x783   : > { %v1785_v54 = vmul.f32 %v1769_v38, %v3687_v61  ;;  %v1755_v41 = vadd.f32 1.0, %v2888_v36  ;;  %v1770_v62 = vmul.f32 0.5, %v1754_v51 }
 0x784   : > { %v1796_v52 = vpack.c.bf16 %v1784_v42, %v1782_v45 }
 0x785   : > { %v2890_v44 = vpop.eup %2889  ;;  %v1797_v47 = vpack.c.bf16 %v1785_v54, %v1783_v43  ;;  %v1771_v48 = vmul.f32 0.5, %v1755_v41  ;;  %v1786_v39 = vmul.f32 %v1770_v62, %v3695_v25 }
 0x786   : > { %v1756_v49 = vadd.f32 1.0, %v2890_v44 }
 0x787   : > { %v2892_v53 = vpop.eup %2891  ;;  %1977 = vmatprep.mubr.bf16.mxu1 %v1797_v47  ;;  %v1787_v20 = vmul.f32 %v1771_v48, %v3703_v32 }
 0x788   : > { %1978 = vmatmul.mubr.bf16.vlgmr.msra.gmra.mxu1 %v1796_v52  ;;  %v1757_v58 = vadd.f32 1.0, %v2892_v53  ;;  %v1772_v60 = vmul.f32 0.5, %v1756_v49 }
 0x789   : > { %v2894_v63 = vpop.eup %2893 }
 0x78a   : > { %v1773_v1 = vmul.f32 0.5, %v1757_v58  ;;  %v1788_v61 = vmul.f32 %v1772_v60, %v3710_v23  ;;  %v1758_v11 = vadd.f32 1.0, %v2894_v63 }
 0x78b   : > { %v2896_v46 = vpop.eup %2895 }
 0x78c   : > { %v2898_v3 = vpop.eup %2897  ;;  %v1789_v35 = vmul.f32 %v1773_v1, %v3718_v59  ;;  %v1759_v5 = vadd.f32 1.0, %v2896_v46  ;;  %v1798_v55 = vpack.c.bf16 %v1788_v61, %v1786_v39  ;;  %v1774_v17 = vmul.f32 0.5, %v1758_v11 }
 0x78d   : > { %v1760_v7 = vadd.f32 1.0, %v2898_v3 }
 0x78e   : > { %v1799_v9 = vpack.c.bf16 %v1789_v35, %v1787_v20  ;;  %v1775_v56 = vmul.f32 0.5, %v1759_v5  ;;  %v1790_v25 = vmul.f32 %v1774_v17, %v3725_v6 }
 0x78f   : > { %v2900_v13 = vpop.eup %2899  ;;  %v1776_v8 = vmul.f32 0.5, %v1760_v7 }
 0x790   : > { %1985 = vmatprep.mubr.bf16.mxu1 %v1799_v9  ;;  %v1761_v16 = vadd.f32 1.0, %v2900_v13  ;;  %v1791_v32 = vmul.f32 %v1775_v56, %v3732_v24 }
 0x791   : > { %1986 = vmatmul.mubr.bf16.gmra.mxu1 %v1798_v55  ;;  %v1792_v0 = vmul.f32 %v1776_v8, %v3735_v21 }
 0x792   : > { %v1777_v23 = vmul.f32 0.5, %v1761_v16 }
 0x793   : > { %v1800_v40 = vpack.c.bf16 %v1792_v0, %v1790_v25 }
 0x794   : > { %v1793_v59 = vmul.f32 %v1777_v23, %v3747_v50 }
 0x796   : > { %v1801_v18 = vpack.c.bf16 %v1793_v59, %v1791_v32 }
 0x798   : > { %1993 = vmatprep.mubr.bf16.mxu1 %v1801_v18 }
 0x799   : > { %1994 = vmatmul.mubr.bf16.gmra.mxu1 %v1800_v40 }
 0x842   : > { %v2511_v26 = vpop.f32.mrf.mxu0 }
 0x844   : > { %v2512_v28 = vpop.f32.mrf.mxu0 }
 0x845   : > { %v2513_v22 = vadd.f32 %v2512_v28, %v2511_v26 }
 0x846   : > { %v2514_v29 = vpop.f32.mrf.mxu0 }
 0x847   : > { %v1972_v30 = vadd.f32 %v2513_v22, %v2390_v27 }
 0x848   : > { %v2517_v21 = vpop.f32.mrf.mxu1  ;;  %v2515_v31 = vpop.f32.mrf.mxu0 }
 0x849   : > { %v2516_v24 = vadd.f32 %v2515_v31, %v2514_v29  ;;  %v2002_v50 = vadd.f32 %v1972_v30, %v3601_v19 }
 0x84a   : > { %v2518_v34 = vpop.f32.mrf.mxu1 }
 0x84b   : > { %v2519_v6 = vadd.f32 %v2518_v34, %v2517_v21  ;;  %v1975_v33 = vadd.f32 %v2516_v24, %v2390_v27  ;;  %2010 = vadd.xlane.f32.xlu0 %v2002_v50 }
 0x84c   : > { %v2520_v37 = vpop.f32.mrf.mxu1 }
 0x84d   : > { %v1980_v38 = vadd.f32 %v2519_v6, %v2390_v27  ;;  %v2003_v36 = vadd.f32 %v1975_v33, %v3603_v57 }
 0x84e   : > { %v2521_v42 = vpop.f32.mrf.mxu1 }
 0x84f   : > { %v2522_v43 = vadd.f32 %v2521_v42, %v2520_v37  ;;  %v2004_v54 = vadd.f32 %v1980_v38, %v3613_v4  ;;  %2012 = vadd.xlane.f32.xlu1 %v2003_v36 }
 0x851   : > { %v1983_v45 = vadd.f32 %v2522_v43, %v2390_v27  ;;  %v2523_v41 = vpop.f32.mrf.mxu1  ;;  %2014 = vadd.xlane.f32.xlu0 %v2004_v54 }
 0x853   : > { %v2524_v44 = vpop.f32.mrf.mxu1  ;;  %v2005_v47 = vadd.f32 %v1983_v45, %v3610_v2 }
 0x854   : > { %v2525_v19 = vadd.f32 %v2524_v44, %v2523_v41 }
 0x855   : > { %v2526_v51 = vpop.f32.mrf.mxu1  ;;  %2016 = vadd.xlane.f32.xlu1 %v2005_v47 }
 0x856   : > { %v1988_v52 = vadd.f32 %v2525_v19, %v2390_v27 }
 0x857   : > { %v2527_v49 = vpop.f32.mrf.mxu1 }
 0x858   : > { %v2528_v53 = vadd.f32 %v2527_v49, %v2526_v51  ;;  %v2006_v58 = vadd.f32 %v1988_v52, %v3622_v12 }
 0x859   : > { %v2529_v48 = vpop.f32.mrf.mxu1 }
 0x85a   : > { %v1991_v57 = vadd.f32 %v2528_v53, %v2390_v27  ;;  %2018 = vadd.xlane.f32.xlu0 %v2006_v58 }
 0x85b   : > { %v2530_v60 = vpop.f32.mrf.mxu1 }
 0x85c   : > { %v2007_v4 = vadd.f32 %v1991_v57, %v3619_v10  ;;  %v2531_v62 = vadd.f32 %v2530_v60, %v2529_v48 }
 0x85d   : > { %v2532_v63 = vpop.f32.mrf.mxu1 }
 0x85e   : > { %2020 = vadd.xlane.f32.xlu1 %v2007_v4  ;;  %v1996_v1 = vadd.f32 %v2531_v62, %v2390_v27 }
 0x85f   : > { %v2533_v46 = vpop.f32.mrf.mxu1 }
 0x860   : > { %v2534_v2 = vadd.f32 %v2533_v46, %v2532_v63  ;;  %v2008_v61 = vadd.f32 %v1996_v1, %v3630_v15  ;;  %v2408_v1 = vld [vmem:[%s3937_s27] ss:$0 sm:$0xff] }
 0x862   : > { %v1999_v3 = vadd.f32 %v2534_v2, %v2390_v27  ;;  %2022 = vadd.xlane.f32.xlu0 %v2008_v61 }
 0x864   : > { %v2009_v20 = vadd.f32 %v1999_v3, %v3628_v14 }
 0x866   : > { %2024 = vadd.xlane.f32.xlu1 %v2009_v20 }
 0x8d4   : > { %v2011_v12 = vpop.xlane.xlu0 %2010 }
 0x8d5   : > { %v2026_v35 = vmul.f32 0.0078125, %v2011_v12 }
 0x8d7   : > { %v2034_v39 = vsub.f32 %v2002_v50, %v2026_v35 }
 0x8d8   : > { %v2013_v5 = vpop.xlane.xlu1 %2012 }
 0x8d9   : > { %v2027_v7 = vmul.f32 0.0078125, %v2013_v5  ;;  %v2042_v9 = vmul.f32 %v2034_v39, %v2034_v39 }
 0x8da   : > { %v2015_v10 = vpop.xlane.xlu0 %2014 }
 0x8db   : > { %v2028_v11 = vmul.f32 0.0078125, %v2015_v10  ;;  %v2035_v55 = vsub.f32 %v2003_v36, %v2027_v7  ;;  %2050 = vadd.xlane.f32.xlu0 %v2042_v9 }
 0x8dd   : > { %v3783_v13 = vsub.f32 %v2004_v54, %v2028_v11  ;;  %v2043_v8 = vmul.f32 %v2035_v55, %v2035_v55 }
 0x8de   : > { %v2017_v16 = vpop.xlane.xlu1 %2016 }
 0x8df   : > { %v2029_v15 = vmul.f32 0.0078125, %v2017_v16  ;;  %v2044_v56 = vmul.f32 %v3783_v13, %v3783_v13  ;;  %2052 = vadd.xlane.f32.xlu1 %v2043_v8 }
 0x8e1   : > { %v3787_v14 = vsub.f32 %v2005_v47, %v2029_v15  ;;  %2054 = vadd.xlane.f32.xlu0 %v2044_v56 }
 0x8e3   : > { %v2019_v17 = vpop.xlane.xlu0 %2018  ;;  %v2045_v23 = vmul.f32 %v3787_v14, %v3787_v14 }
 0x8e4   : > { %v2030_v0 = vmul.f32 0.0078125, %v2019_v17 }
 0x8e5   : > { %2056 = vadd.xlane.f32.xlu1 %v2045_v23 }
 0x8e6   : > { %v3791_v32 = vsub.f32 %v2006_v58, %v2030_v0  ;;  %v2407_v58 = vld [vmem:[%s3882_s12] ss:$0 sm:$0xff] }
 0x8e7   : > { %v2021_v59 = vpop.xlane.xlu1 %2020 }
 0x8e8   : > { %v2031_v25 = vmul.f32 0.0078125, %v2021_v59  ;;  %v2046_v18 = vmul.f32 %v3791_v32, %v3791_v32 }
 0x8ea   : > { %v3795_v40 = vsub.f32 %v2007_v4, %v2031_v25  ;;  %2058 = vadd.xlane.f32.xlu0 %v2046_v18 }
 0x8eb   : > { %v2023_v26 = vpop.xlane.xlu0 %2022 }
 0x8ec   : > { %v2047_v27 = vmul.f32 %v3795_v40, %v3795_v40  ;;  %v2032_v28 = vmul.f32 0.0078125, %v2023_v26 }
 0x8ee   : > { %2060 = vadd.xlane.f32.xlu1 %v2047_v27  ;;  %v3799_v22 = vsub.f32 %v2008_v61, %v2032_v28 }
 0x8ef   : > { %v2025_v29 = vpop.xlane.xlu1 %2024 }
 0x8f0   : > { %v2033_v30 = vmul.f32 0.0078125, %v2025_v29  ;;  %v2048_v21 = vmul.f32 %v3799_v22, %v3799_v22 }
 0x8f2   : > { %v3803_v31 = vsub.f32 %v2009_v20, %v2033_v30  ;;  %2062 = vadd.xlane.f32.xlu0 %v2048_v21 }
 0x8f4   : > { %v2049_v24 = vmul.f32 %v3803_v31, %v3803_v31 }
 0x8f6   : > { %2064 = vadd.xlane.f32.xlu1 %v2049_v24 }
 0x964   : > { %v2051_v50 = vpop.xlane.xlu0 %2050 }
 0x965   : > { %v2066_v34 = vmul.f32 0.0078125, %v2051_v50 }
 0x967   : > { %v2074_v6 = vadd.f32 1e-05, %v2066_v34 }
 0x968   : > { %v2053_v33 = vpop.xlane.xlu1 %2052 }
 0x969   : > { %2901 = vrsqrt.f32 %v2074_v6  ;;  %v2067_v37 = vmul.f32 0.0078125, %v2053_v33 }
 0x96a   : > { %v2055_v38 = vpop.xlane.xlu0 %2054 }
 0x96b   : > { %v2068_v36 = vmul.f32 0.0078125, %v2055_v38  ;;  %v2075_v42 = vadd.f32 1e-05, %v2067_v37 }
 0x96d   : > { %v2076_v43 = vadd.f32 1e-05, %v2068_v36  ;;  %2903 = vrsqrt.f32 %v2075_v42 }
 0x96e   : > { %v2057_v54 = vpop.xlane.xlu1 %2056 }
 0x96f   : > { %2905 = vrsqrt.f32 %v2076_v43  ;;  %v2069_v45 = vmul.f32 0.0078125, %v2057_v54 }
 0x971   : > { %v2077_v41 = vadd.f32 1e-05, %v2069_v45 }
 0x973   : > { %2907 = vrsqrt.f32 %v2077_v41  ;;  %v2059_v44 = vpop.xlane.xlu0 %2058 }
 0x974   : > { %v2070_v47 = vmul.f32 0.0078125, %v2059_v44 }
 0x976   : > { %v2078_v19 = vadd.f32 1e-05, %v2070_v47  ;;  %v2902_v51 = vpop.eup %2901 }
 0x977   : > { %v2061_v52 = vpop.xlane.xlu1 %2060  ;;  %v2090_v49 = vmul.f32 %v2902_v51, %v2034_v39 }
 0x978   : > { %2909 = vrsqrt.f32 %v2078_v19  ;;  %v2071_v53 = vmul.f32 0.0078125, %v2061_v52 }
 0x979   : > { %v2105_v4 = vmul.f32 %v2407_v58, %v2090_v49 }
 0x97a   : > { %v2079_v57 = vadd.f32 1e-05, %v2071_v53  ;;  %v2904_v48 = vpop.eup %2903 }
 0x97b   : > { %v2091_v62 = vmul.f32 %v2904_v48, %v2035_v55  ;;  %v2063_v63 = vpop.xlane.xlu0 %2062  ;;  %v2120_v12 = vadd.f32 %v2408_v1, %v2105_v4 }
 0x97c   : > { %v2906_v60 = vpop.eup %2905  ;;  %2911 = vrsqrt.f32 %v2079_v57  ;;  %v2072_v2 = vmul.f32 0.0078125, %v2063_v63 }
 0x97d   : > { %v2092_v46 = vmul.f32 %v2906_v60, %v3783_v13  ;;  %v2106_v61 = vmul.f32 %v2407_v58, %v2091_v62 }
 0x97e   : > { %v2080_v3 = vadd.f32 1e-05, %v2072_v2 }
 0x97f   : > { %v2121_v35 = vadd.f32 %v2408_v1, %v2106_v61  ;;  %v2065_v39 = vpop.xlane.xlu1 %2064  ;;  %v2107_v5 = vmul.f32 %v2407_v58, %v2092_v46 }
 0x980   : > { %v2908_v20 = vpop.eup %2907  ;;  %2913 = vrsqrt.f32 %v2080_v3  ;;  %v2073_v9 = vmul.f32 0.0078125, %v2065_v39 }
 0x981   : > { %v2093_v7 = vmul.f32 %v2908_v20, %v3787_v14  ;;  %v2435_v10 = vpack.c.bf16 %v2121_v35, %v2120_v12  ;;  %v2122_v13 = vadd.f32 %v2408_v1, %v2107_v5 }
 0x982   : > { %v2081_v55 = vadd.f32 1e-05, %v2073_v9 }
 0x983   : > { %v2108_v11 = vmul.f32 %v2407_v58, %v2093_v7  ;;  %2436 = vst [vmem:[%s577_s24] sm:$0xff] %v2435_v10  }
 0x984   : > { %2915 = vrsqrt.f32 %v2081_v55 }
 0x985   : > { %v2910_v8 = vpop.eup %2909  ;;  %v2123_v16 = vadd.f32 %v2408_v1, %v2108_v11 }
 0x986   : > { %v2094_v15 = vmul.f32 %v2910_v8, %v3791_v32 }
 0x987   : > { %v2440_v56 = vpack.c.bf16 %v2123_v16, %v2122_v13 }
 0x988   : > { %v2109_v23 = vmul.f32 %v2407_v58, %v2094_v15 }
 0x989   : > { %v2912_v17 = vpop.eup %2911  ;;  %2452 = vst [vmem:[%s577_s24 + $0x8] sm:$0xff] %v2440_v56  }
 0x98a   : > { %v2095_v14 = vmul.f32 %v2912_v17, %v3795_v40  ;;  %v2124_v25 = vadd.f32 %v2408_v1, %v2109_v23 }
 0x98c   : > { %v2110_v0 = vmul.f32 %v2407_v58, %v2095_v14 }
 0x98d   : > { %v2914_v59 = vpop.eup %2913 }
 0x98e   : > { %v2125_v18 = vadd.f32 %v2408_v1, %v2110_v0  ;;  %v2096_v26 = vmul.f32 %v2914_v59, %v3799_v22 }
 0x990   : > { %v2445_v27 = vpack.c.bf16 %v2125_v18, %v2124_v25  ;;  %v2111_v29 = vmul.f32 %v2407_v58, %v2096_v26 }
 0x991   : > { %v2916_v28 = vpop.eup %2915 }
 0x992   : > { %2453 = vst [vmem:[%s577_s24 + $0x10] sm:$0xff] %v2445_v27   ;;  %v2097_v32 = vmul.f32 %v2916_v28, %v3803_v31  ;;  %v2126_v21 = vadd.f32 %v2408_v1, %v2111_v29 }
 0x994   : > { %v2112_v30 = vmul.f32 %v2407_v58, %v2097_v32 }
 0x996   : > { %v2127_v24 = vadd.f32 %v2408_v1, %v2112_v30 }
 0x998   : > { %v2450_v40 = vpack.c.bf16 %v2127_v24, %v2126_v21 }
 0x99a   : > { %2454 = vst [vmem:[%s577_s24 + $0x18] sm:$0xff] %v2450_v40  }
 0x99b   : > { %3090 = shalt.err (!%p3087_p2)
}
 0x99c   : > { %s3091_s15 = scalar_lea.hbm %s3825_s8, 512  ;;  %s3095_s2 = scalar_lea.hbm %s3940_s4, 1024 }
 0x99d   : > { %p3092_p8 = scmp.ne.s32.totalorder %s3825_s8, %s3091_s15  ;;  %p3096_p9 = scmp.lt.s32.totalorder %s3825_s8, %s3940_s4 }
 0x99e   : > { %p3097_p13 = scmp.lt.s32.totalorder %s3095_s2, %s3091_s15 }
 0x99f   : > { %p3093_p11 = pnand %p3092_p8, %p3941_p1 }
 0x9a0   : > { %p3098_p5 = por %p3097_p13, %p3096_p9 }
 0x9a1   : > { %p3094_p7 = pneg %p3093_p11 }
 0x9a3   : > { %p3099_p10 = pnand %p3098_p5, %p3094_p7 }
 0x9a5   : > { %3102 = shalt.err (!%p3099_p10)
}
 0x9a6   : > { %s3174_s24 = smov 64   ;;  %s3175_s19 = smov 4  }
 0x9a7   : > { %2651 = dma.vmem_to_hbm [thread:$0]  (%p3941_p1), %s3827_s22, 512, %s3825_s8, %s2169_s25, %s3174_s24, %s3174_s24, %s3175_s19  }
 0x9a8 PF: > { %s3942_s10 = sld [smem:[#allocation20_spill]]  ;;  %p3945_p12 = scmp.ge.s32.totalorder %s3157_s16, 2 }
 0x9a9   : > { %s3943_s23 = sld [smem:[#allocation22_spill]] }
 0x9ae   : > { %s2197_s29 = sand.u32 1, %s3942_s10  }
 0x9af   : > { %p3944_p6 = scmp.ne.s32.totalorder %s3943_s23, 0  ;;  %s2198_s28 = scalar_lea.sflag [#allocation4], %s2197_s29 }
 0x9b1   : > { %p2674_p4 = pnand %p3945_p12, %p3944_p6 }
 0x9b3   : > { %p2675_p0 = pneg %p2674_p4 }
 0x9b5   : > { %3140 = dma.done.wait (%p2675_p0), %s2198_s28, 512  }
 0x9b6   : > { %3142 = vsyncadd (%p2675_p0), %s2198_s28, 4294966784  ;;  %s3946_s16 = sld [smem:[#allocation23_spill]]  ;;  %s3949_s29 = smov %s3149_s30 }
 0x9b7   : > { %s3947_s17 = sld [smem:[#allocation21_spill]] }
 0x9b8   : > { %s3948_s15 = sld [smem:[#allocation25_spill]] }
 0x9bc   : > { %p32_p3 = scmp.ge.s32.totalorder %s3946_s16, 4  }
 0x9bd   : > { %s3950_s30 = smov %s3947_s17 }
 0x9be   :  { %34 = sbr.rel (!%p32_p3) target bundleno = 17 (0x11), region = 150 }
 0x9c3   :  { %2203 = vsyncpa [#allocation3], 1 }
 0x9c4   :  { %2205 = vsyncpa [#allocation3 + $0x1], 1 }
 0x9c5   :  { %2206 = vsyncpa [#allocation6], 1 }
 0x9c6   :  { %2208 = vsyncpa [#allocation6 + $0x1], 1 }
 0x9c7   :  { %2209 = vsyncpa [#allocation9], 1 }
 0x9c8   :  { %2210 = vsyncpa [#allocation12], 1 }
 0x9c9   :  { %2211 = vsyncpa [#allocation4], 1 }
 0x9ca   :  { %2213 = vsyncpa [#allocation4 + $0x1], 1 }

</bundles_post_ra>
